<compile_context>
chip_gen: v5e
topology: v5e:2x2
jax: 0.10.0
libtpu: 0.0.40
codegen_flags: <defaults>
</compile_context>

<pallas_src>
import numpy as np
import jax
import jax.numpy as jnp
from jax import lax
from jax.experimental import pallas as pl
from jax.experimental.pallas import tpu as pltpu


def _make_kernel(Bp, T, W, K, C):
    I = 2 * W          # LSTM input size  = wordvector_size * num_inputs
    H = I              # module uses hidden_size == input_size
    R = T * Bp         # flat time-major row count (row = t*Bp + b)

    def kernel(data_ref, know_ref, lens_ref,
               ke_w_ref, ke_b_ref,
               wih_f_ref, whh_f_ref, b_f_ref,
               wih_r_ref, whh_r_ref, b_r_ref,
               dw_ref, db_ref,
               crf_start_ref, crf_end_ref, crf_trans_ref,
               logits_ref, decoded_ref,
               gin_f_s, gin_b_s, hf_s, hb_s, hist_s):
        # ---- 1. knowledge embedding + LSTM input projections, batched over all (t, b) rows ----
        emb = jnp.dot(know_ref[...], ke_w_ref[...],
                      preferred_element_type=jnp.float32) + ke_b_ref[...]        # (R, W)
        x = jnp.concatenate([data_ref[...], emb], axis=-1)                       # (R, I)
        gin_f_s[...] = jnp.dot(x, wih_f_ref[...],
                               preferred_element_type=jnp.float32) + b_f_ref[...]  # (R, 4H)
        gin_b_s[...] = jnp.dot(x, wih_r_ref[...],
                               preferred_element_type=jnp.float32) + b_r_ref[...]  # (R, 4H)

        # ---- 2. bidirectional LSTM: both directions interleaved in one serial loop ----
        def gate_block(g, c):
            i_g = jax.nn.sigmoid(g[:, 0:H])
            f_g = jax.nn.sigmoid(g[:, H:2 * H])
            g_g = jnp.tanh(g[:, 2 * H:3 * H])
            o_g = jax.nn.sigmoid(g[:, 3 * H:4 * H])
            c_new = f_g * c + i_g * g_g
            h_new = o_g * jnp.tanh(c_new)
            return h_new, c_new

        def step(s, carry):
            hf, cf, hb, cb = carry
            row_f = pl.multiple_of(s * Bp, Bp)
            row_b = pl.multiple_of((T - 1 - s) * Bp, Bp)
            gf = gin_f_s[pl.ds(row_f, Bp), :] + jnp.dot(
                hf, whh_f_ref[...], preferred_element_type=jnp.float32)
            gb = gin_b_s[pl.ds(row_b, Bp), :] + jnp.dot(
                hb, whh_r_ref[...], preferred_element_type=jnp.float32)
            hf_new, cf_new = gate_block(gf, cf)
            hb_new, cb_new = gate_block(gb, cb)
            hf_s[pl.ds(row_f, Bp), :] = hf_new
            hb_s[pl.ds(row_b, Bp), :] = hb_new
            return hf_new, cf_new, hb_new, cb_new

        zeros = jnp.zeros((Bp, H), jnp.float32)
        lax.fori_loop(0, T, step, (zeros, zeros, zeros, zeros))

        # ---- 3. dense projection (emissions / logits), one batched matmul + one slab store ----
        feat = jnp.concatenate([hf_s[...], hb_s[...]], axis=-1)                  # (R, 2H)
        em = jnp.dot(feat, dw_ref[...],
                     preferred_element_type=jnp.float32) + db_ref[...]           # (R, C)
        logits_ref[...] = em

        # ---- 4. CRF Viterbi decode (pytorch-crf style, batch_first) ----
        trans = crf_trans_ref[...]                                               # (C, C)
        lens = lens_ref[...]                                                     # (Bp, 1) int32
        iota_from = lax.broadcasted_iota(jnp.int32, (Bp, C, C), 1)               # hoisted
        iota_c = lax.broadcasted_iota(jnp.int32, (1, C), 1)                      # hoisted
        iota_t = lax.broadcasted_iota(jnp.int32, (1, T), 1)                      # hoisted

        score0 = crf_start_ref[...] + logits_ref[pl.ds(0, Bp), :]                # (Bp, C)

        def vit_body(t, score):
            em_t = logits_ref[pl.ds(pl.multiple_of(t * Bp, Bp), Bp), :]          # (Bp, C)
            nxt = score[:, :, None] + trans[None, :, :] + em_t[:, None, :]       # (Bp, Cf, Ct)
            best = jnp.max(nxt, axis=1)                                          # (Bp, Ct)
            idx = jnp.min(jnp.where(nxt >= best[:, None, :], iota_from, C),
                          axis=1).astype(jnp.int32)                              # first argmax
            hist_s[pl.ds(pl.multiple_of((t - 1) * Bp, Bp), Bp), :] = idx
            return jnp.where(lens > t, best, score)                              # mask gate

        score = lax.fori_loop(1, T, vit_body, score0)
        score = score + crf_end_ref[...]                                         # (Bp, C)

        # last tag per sequence (first-index argmax), then vectorized backtracking over all rows
        mx = jnp.max(score, axis=-1, keepdims=True)                              # (Bp, 1)
        best_last = jnp.min(jnp.where(score >= mx, iota_c, C),
                            axis=-1, keepdims=True).astype(jnp.int32)            # (Bp, 1)
        tags0 = jnp.where(iota_t == (lens - 1), best_last, 0)                    # (Bp, T)

        def bt_body(s, carry):
            cur, tags = carry
            t = T - 2 - s
            row = hist_s[pl.ds(pl.multiple_of(t * Bp, Bp), Bp), :]               # (Bp, C)
            val = jnp.sum(jnp.where(iota_c == cur, row, 0),
                          axis=-1, keepdims=True).astype(jnp.int32)              # (Bp, 1)
            active = t < (lens - 1)                                              # (Bp, 1)
            cur = jnp.where(active, val, cur)
            tags = jnp.where(jnp.logical_and(iota_t == t, active), cur, tags)
            return cur, tags

        _, tags = lax.fori_loop(0, T - 1, bt_body, (best_last, tags0))
        decoded_ref[...] = tags

    return kernel


def bilstm_medic_forward(data, knowledge, mask, params):
    B, T, W = data.shape
    assert T >= 2, "kernel assumes at least 2 timesteps"
    K = knowledge.shape[-1]
    C = params["crf_trans"].shape[0]
    I = 2 * W
    H = I
    Bp = ((B + 7) // 8) * 8           # pad batch to full sublane tiles
    R = T * Bp

    data = data.astype(jnp.float32)
    knowledge = knowledge.astype(jnp.float32)
    lens = jnp.sum(mask.astype(jnp.int32), axis=1)                   # (B,) contiguous-prefix mask

    pad = Bp - B
    data_tm = jnp.transpose(data, (1, 0, 2))                         # (T, B, W) — layout plumbing
    know_tm = jnp.transpose(knowledge, (1, 0, 2))                    # (T, B, K)
    if pad:
        data_tm = jnp.pad(data_tm, ((0, 0), (0, pad), (0, 0)))
        know_tm = jnp.pad(know_tm, ((0, 0), (0, pad), (0, 0)))
        lens = jnp.pad(lens, (0, pad))
    data_flat = data_tm.reshape(R, W)                                # row = t*Bp + b
    know_flat = know_tm.reshape(R, K)
    lens2 = lens.astype(jnp.int32).reshape(Bp, 1)

    kernel = _make_kernel(Bp, T, W, K, C)
    vspec = pl.BlockSpec(memory_space=pltpu.MemorySpace.VMEM)

    inputs = (
        data_flat,                                          # (R, W)
        know_flat,                                          # (R, K)
        lens2,                                              # (Bp, 1)
        params["ke_w"].T,                                   # (K, W)
        params["ke_b"][None, :],                            # (1, W)
        params["w_ih_f"].T,                                 # (I, 4H)
        params["w_hh_f"].T,                                 # (H, 4H)
        (params["b_ih_f"] + params["b_hh_f"])[None, :],     # (1, 4H)
        params["w_ih_r"].T,
        params["w_hh_r"].T,
        (params["b_ih_r"] + params["b_hh_r"])[None, :],
        params["dense_w"].T,                                # (2H, C)
        params["dense_b"][None, :],                         # (1, C)
        params["crf_start"][None, :],                       # (1, C)
        params["crf_end"][None, :],                         # (1, C)
        params["crf_trans"],                                # (C, C)
    )

    logits_flat, decoded_p = pl.pallas_call(
        kernel,
        out_shape=(
            jax.ShapeDtypeStruct((R, C), jnp.float32),      # emissions, time-major flat
            jax.ShapeDtypeStruct((Bp, T), jnp.int32),       # Viterbi best paths
        ),
        in_specs=[vspec] * len(inputs),
        out_specs=(vspec, vspec),
        scratch_shapes=[
            pltpu.VMEM((R, 4 * H), jnp.float32),            # forward  input-projection gates
            pltpu.VMEM((R, 4 * H), jnp.float32),            # backward input-projection gates
            pltpu.VMEM((R, H), jnp.float32),                # forward hidden states
            pltpu.VMEM((R, H), jnp.float32),                # backward hidden states
            pltpu.VMEM(((T - 1) * Bp, C), jnp.int32),       # Viterbi backpointers
        ],
    )(*inputs)

    logits = jnp.transpose(logits_flat.reshape(T, Bp, C), (1, 0, 2))[:B]   # (B, T, C)
    decoded = decoded_p[:B]                                                # (B, T)
    return logits, decoded


def init_params(key, W, K, C):
    I = 2 * W
    H = I
    ks = jax.random.split(key, 15)

    def u(k, shape, scale):
        return jax.random.uniform(k, shape, jnp.float32, -1.0, 1.0) * scale

    return dict(
        ke_w=u(ks[0], (W, K), 0.3),            # nn.Linear(num_knowledge_in_features, W).weight
        ke_b=u(ks[1], (W,), 0.3),
        w_ih_f=u(ks[2], (4 * H, I), 0.08),     # nn.LSTM weight_ih_l0
        w_hh_f=u(ks[3], (4 * H, H), 0.08),     # nn.LSTM weight_hh_l0
        b_ih_f=u(ks[4], (4 * H,), 0.08),
        b_hh_f=u(ks[5], (4 * H,), 0.08),
        w_ih_r=u(ks[6], (4 * H, I), 0.08),     # *_reverse direction
        w_hh_r=u(ks[7], (4 * H, H), 0.08),
        b_ih_r=u(ks[8], (4 * H,), 0.08),
        b_hh_r=u(ks[9], (4 * H,), 0.08),
        dense_w=u(ks[10], (C, 2 * H), 0.2),    # nn.Linear(2H, num_data_classes)
        dense_b=u(ks[11], (C,), 0.2),
        crf_start=u(ks[12], (C,), 0.5),
        crf_end=u(ks[13], (C,), 0.5),
        crf_trans=u(ks[14], (C, C), 0.5),
    )


def reference_logits_np(data, knowledge, params):
    """Exact float32 numpy forward (embedding + BiLSTM + dense) mirroring PyTorch semantics."""
    data = np.asarray(data, np.float32)
    knowledge = np.asarray(knowledge, np.float32)
    p = {k: np.asarray(v, np.float32) for k, v in params.items()}
    B, T, W = data.shape
    H = 2 * W

    emb = knowledge @ p["ke_w"].T + p["ke_b"]               # (B, T, W)
    x = np.concatenate([data, emb], axis=2)                 # (B, T, 2W)

    def sigmoid(z):
        return 1.0 / (1.0 + np.exp(-z))

    def run_lstm(wih, whh, bih, bhh, reverse):
        h = np.zeros((B, H), np.float32)
        c = np.zeros((B, H), np.float32)
        out = np.zeros((B, T, H), np.float32)
        order = range(T - 1, -1, -1) if reverse else range(T)
        for t in order:
            gates = x[:, t, :] @ wih.T + h @ whh.T + bih + bhh
            i = sigmoid(gates[:, 0:H]); f = sigmoid(gates[:, H:2 * H])
            g = np.tanh(gates[:, 2 * H:3 * H]); o = sigmoid(gates[:, 3 * H:4 * H])
            c = f * c + i * g
            h = o * np.tanh(c)
            out[:, t, :] = h
        return out

    hf = run_lstm(p["w_ih_f"], p["w_hh_f"], p["b_ih_f"], p["b_hh_f"], False)
    hb = run_lstm(p["w_ih_r"], p["w_hh_r"], p["b_ih_r"], p["b_hh_r"], True)
    lstm_out = np.concatenate([hf, hb], axis=2)
    return lstm_out @ p["dense_w"].T + p["dense_b"]         # (B, T, C)


def viterbi_decode_np(logits, mask, start, end, trans):
    """pytorch-crf style batch_first viterbi_decode, float32, zero-padded output."""
    logits = np.asarray(logits, np.float32)
    mask = np.asarray(mask)
    start = np.asarray(start, np.float32)
    end = np.asarray(end, np.float32)
    trans = np.asarray(trans, np.float32)
    B, T, C = logits.shape
    decoded = np.zeros((B, T), np.int64)
    for b in range(B):
        L = int(mask[b].sum())
        em = logits[b]
        score = start + em[0]
        history = []
        for t in range(1, T):
            nxt = score[:, None] + trans + em[t][None, :]
            best = nxt.max(axis=0)
            history.append(nxt.argmax(axis=0))
            if mask[b, t]:
                score = best
        score = score + end
        best_last = int(score.argmax())
        tags = [best_last]
        for t in range(L - 2, -1, -1):
            best_last = int(history[t][tags[-1]])
            tags.append(best_last)
        tags.reverse()
        decoded[b, :L] = tags
    return decoded


if __name__ == "__main__":
    # Small shapes consistent with the module structure (wordvector_size shrunk for the test).
    B, T, W, K, C = 2, 8, 64, 32, 5
    key = jax.random.PRNGKey(0)
    k_data, k_know, k_par = jax.random.split(key, 3)

    data = jax.random.normal(k_data, (B, T, W), jnp.float32) * 0.5
    knowledge = jax.random.normal(k_know, (B, T, K), jnp.float32)
    lengths = jnp.array([T, T - 3], jnp.int32)
    mask = jnp.arange(T)[None, :] < lengths[:, None]        # (B, T) bool, contiguous prefix
    params = init_params(k_par, W, K, C)

    logits, decoded = bilstm_medic_forward(data, knowledge, mask, params)
    jax.block_until_ready((logits, decoded))

    # Logits vs exact f32 reference (default MXU precision -> slightly looser tolerance).
    ref_logits = reference_logits_np(np.asarray(data), np.asarray(knowledge),
                                     {k: np.asarray(v) for k, v in params.items()})
    np.testing.assert_allclose(np.asarray(logits), ref_logits, rtol=2e-2, atol=2e-2)

    # Viterbi decode must agree exactly with a numpy decode run on the kernel's own emissions
    # (the f32 CRF recursion is bit-exact), decoupling decode correctness from matmul precision.
    ref_decoded = viterbi_decode_np(np.asarray(logits), np.asarray(mask),
                                    params["crf_start"], params["crf_end"], params["crf_trans"])
    assert np.array_equal(np.asarray(decoded), ref_decoded.astype(np.int32))

    print("KERNEL_OK")
</pallas_src>

<mosaic_0001>
module attributes {stable_mosaic.version = 11 : i64} {
  func.func @kernel(%arg0: memref<64x64xf32, #tpu.memory_space<vmem>>, %arg1: memref<64x32xf32, #tpu.memory_space<vmem>>, %arg2: memref<8x1xi32, #tpu.memory_space<vmem>>, %arg3: memref<32x64xf32, #tpu.memory_space<vmem>>, %arg4: memref<1x64xf32, #tpu.memory_space<vmem>>, %arg5: memref<128x512xf32, #tpu.memory_space<vmem>>, %arg6: memref<128x512xf32, #tpu.memory_space<vmem>>, %arg7: memref<1x512xf32, #tpu.memory_space<vmem>>, %arg8: memref<128x512xf32, #tpu.memory_space<vmem>>, %arg9: memref<128x512xf32, #tpu.memory_space<vmem>>, %arg10: memref<1x512xf32, #tpu.memory_space<vmem>>, %arg11: memref<256x5xf32, #tpu.memory_space<vmem>>, %arg12: memref<1x5xf32, #tpu.memory_space<vmem>>, %arg13: memref<1x5xf32, #tpu.memory_space<vmem>>, %arg14: memref<1x5xf32, #tpu.memory_space<vmem>>, %arg15: memref<5x5xf32, #tpu.memory_space<vmem>>, %arg16: memref<64x5xf32, #tpu.memory_space<vmem>>, %arg17: memref<8x8xi32, #tpu.memory_space<vmem>>, %arg18: memref<64x512xf32, #tpu.memory_space<vmem>>, %arg19: memref<64x512xf32, #tpu.memory_space<vmem>>, %arg20: memref<64x128xf32, #tpu.memory_space<vmem>>, %arg21: memref<64x128xf32, #tpu.memory_space<vmem>>, %arg22: memref<56x5xi32, #tpu.memory_space<vmem>>) attributes {dimension_semantics = [], scalar_prefetch = 0 : i64, scratch_operands = 5 : i64, tpu.core_type = #tpu.core_type<tc>} {
    %c0 = arith.constant 0 : index
    %c0_0 = arith.constant 0 : index
    %0 = vector.load %arg1[%c0, %c0_0] : memref<64x32xf32, #tpu.memory_space<vmem>>, vector<64x32xf32>
    %c0_1 = arith.constant 0 : index
    %c0_2 = arith.constant 0 : index
    %1 = vector.load %arg3[%c0_1, %c0_2] : memref<32x64xf32, #tpu.memory_space<vmem>>, vector<32x64xf32>
    %cst = arith.constant dense<0.000000e+00> : vector<64x64xf32>
    %2 = tpu.matmul %0, %1, %cst {dimension_numbers = #tpu.dot_dimension_numbers<[1], [0], [0], [1], [0, 0, 1, 1], [], []>} : vector<64x32xf32>, vector<32x64xf32>, vector<64x64xf32> -> vector<64x64xf32>
    %c0_3 = arith.constant 0 : index
    %c0_4 = arith.constant 0 : index
    %3 = vector.load %arg4[%c0_3, %c0_4] : memref<1x64xf32, #tpu.memory_space<vmem>>, vector<1x64xf32>
    %4 = vector.broadcast %3 : vector<1x64xf32> to vector<64x64xf32>
    %5 = arith.addf %2, %4 : vector<64x64xf32>
    %c0_5 = arith.constant 0 : index
    %c0_6 = arith.constant 0 : index
    %6 = vector.load %arg0[%c0_5, %c0_6] : memref<64x64xf32, #tpu.memory_space<vmem>>, vector<64x64xf32>
    %7 = tpu.concatenate %6, %5 in 1 : vector<64x64xf32>, vector<64x64xf32> -> vector<64x128xf32>
    %c0_7 = arith.constant 0 : index
    %c0_8 = arith.constant 0 : index
    %8 = vector.load %arg5[%c0_7, %c0_8] : memref<128x512xf32, #tpu.memory_space<vmem>>, vector<128x512xf32>
    %cst_9 = arith.constant dense<0.000000e+00> : vector<64x512xf32>
    %9 = tpu.matmul %7, %8, %cst_9 {dimension_numbers = #tpu.dot_dimension_numbers<[1], [0], [0], [1], [0, 0, 1, 1], [], []>} : vector<64x128xf32>, vector<128x512xf32>, vector<64x512xf32> -> vector<64x512xf32>
    %c0_10 = arith.constant 0 : index
    %c0_11 = arith.constant 0 : index
    %10 = vector.load %arg7[%c0_10, %c0_11] : memref<1x512xf32, #tpu.memory_space<vmem>>, vector<1x512xf32>
    %11 = vector.broadcast %10 : vector<1x512xf32> to vector<64x512xf32>
    %12 = arith.addf %9, %11 : vector<64x512xf32>
    %c0_12 = arith.constant 0 : index
    %c0_13 = arith.constant 0 : index
    %13 = vector.load %arg18[%c0_12, %c0_13] : memref<64x512xf32, #tpu.memory_space<vmem>>, vector<64x512xf32>
    tpu.vector_store %arg18[%c0_12, %c0_13], %12 {strides = array<i32>} : memref<64x512xf32, #tpu.memory_space<vmem>>, vector<64x512xf32>,
    %c0_14 = arith.constant 0 : index
    %c0_15 = arith.constant 0 : index
    %14 = vector.load %arg8[%c0_14, %c0_15] : memref<128x512xf32, #tpu.memory_space<vmem>>, vector<128x512xf32>
    %cst_16 = arith.constant dense<0.000000e+00> : vector<64x512xf32>
    %15 = tpu.matmul %7, %14, %cst_16 {dimension_numbers = #tpu.dot_dimension_numbers<[1], [0], [0], [1], [0, 0, 1, 1], [], []>} : vector<64x128xf32>, vector<128x512xf32>, vector<64x512xf32> -> vector<64x512xf32>
    %c0_17 = arith.constant 0 : index
    %c0_18 = arith.constant 0 : index
    %16 = vector.load %arg10[%c0_17, %c0_18] : memref<1x512xf32, #tpu.memory_space<vmem>>, vector<1x512xf32>
    %17 = vector.broadcast %16 : vector<1x512xf32> to vector<64x512xf32>
    %18 = arith.addf %15, %17 : vector<64x512xf32>
    %c0_19 = arith.constant 0 : index
    %c0_20 = arith.constant 0 : index
    %19 = vector.load %arg19[%c0_19, %c0_20] : memref<64x512xf32, #tpu.memory_space<vmem>>, vector<64x512xf32>
    tpu.vector_store %arg19[%c0_19, %c0_20], %18 {strides = array<i32>} : memref<64x512xf32, #tpu.memory_space<vmem>>, vector<64x512xf32>,
    %cst_21 = arith.constant 0.000000e+00 : f32
    %20 = vector.broadcast %cst_21 : f32 to vector<8x128xf32>
    %c0_i32 = arith.constant 0 : i32
    %c8_i32 = arith.constant 8 : i32
    %21 = arith.addi %c0_i32, %c8_i32 : i32
    %c1_i32 = arith.constant 1 : i32
    %22:4 = scf.for %arg23 = %c0_i32 to %21 step %c1_i32 iter_args(%arg24 = %20, %arg25 = %20, %arg26 = %20, %arg27 = %20) -> (vector<8x128xf32>, vector<8x128xf32>, vector<8x128xf32>, vector<8x128xf32>)  : i32 {
      %c8_i32_57 = arith.constant 8 : i32
      %68 = arith.muli %arg23, %c8_i32_57 : i32
      %69 = tpu.assume_multiple %68, 8 : i32
      %c7_i32_58 = arith.constant 7 : i32
      %70 = arith.subi %c7_i32_58, %arg23 : i32
      %c8_i32_59 = arith.constant 8 : i32
      %71 = arith.muli %70, %c8_i32_59 : i32
      %72 = tpu.assume_multiple %71, 8 : i32
      %73 = arith.index_cast %69 : i32 to index
      %c0_60 = arith.constant 0 : index
      %74 = vector.load %arg18[%73, %c0_60] : memref<64x512xf32, #tpu.memory_space<vmem>>, vector<8x512xf32>
      %c0_61 = arith.constant 0 : index
      %c0_62 = arith.constant 0 : index
      %75 = vector.load %arg6[%c0_61, %c0_62] : memref<128x512xf32, #tpu.memory_space<vmem>>, vector<128x512xf32>
      %cst_63 = arith.constant dense<0.000000e+00> : vector<8x512xf32>
      %76 = tpu.matmul %arg24, %75, %cst_63 {dimension_numbers = #tpu.dot_dimension_numbers<[1], [0], [0], [1], [0, 0, 1, 1], [], []>} : vector<8x128xf32>, vector<128x512xf32>, vector<8x512xf32> -> vector<8x512xf32>
      %77 = arith.addf %74, %76 : vector<8x512xf32>
      %78 = arith.index_cast %72 : i32 to index
      %c0_64 = arith.constant 0 : index
      %79 = vector.load %arg19[%78, %c0_64] : memref<64x512xf32, #tpu.memory_space<vmem>>, vector<8x512xf32>
      %c0_65 = arith.constant 0 : index
      %c0_66 = arith.constant 0 : index
      %80 = vector.load %arg9[%c0_65, %c0_66] : memref<128x512xf32, #tpu.memory_space<vmem>>, vector<128x512xf32>
      %cst_67 = arith.constant dense<0.000000e+00> : vector<8x512xf32>
      %81 = tpu.matmul %arg26, %80, %cst_67 {dimension_numbers = #tpu.dot_dimension_numbers<[1], [0], [0], [1], [0, 0, 1, 1], [], []>} : vector<8x128xf32>, vector<128x512xf32>, vector<8x512xf32> -> vector<8x512xf32>
      %82 = arith.addf %79, %81 : vector<8x512xf32>
      %83 = vector.extract_strided_slice %77 {offsets = [0, 0], sizes = [8, 128], strides = [1, 1]} : vector<8x512xf32> to vector<8x128xf32>
      %84 = arith.negf %83 : vector<8x128xf32>
      %85 = math.exp %84 : vector<8x128xf32>
      %cst_68 = arith.constant 1.000000e+00 : f32
      %86 = vector.broadcast %cst_68 : f32 to vector<8x128xf32>
      %87 = arith.addf %86, %85 : vector<8x128xf32>
      %88 = arith.divf %86, %87 : vector<8x128xf32>
      %89 = vector.extract_strided_slice %77 {offsets = [0, 128], sizes = [8, 128], strides = [1, 1]} : vector<8x512xf32> to vector<8x128xf32>
      %90 = arith.negf %89 : vector<8x128xf32>
      %91 = math.exp %90 : vector<8x128xf32>
      %cst_69 = arith.constant 1.000000e+00 : f32
      %92 = vector.broadcast %cst_69 : f32 to vector<8x128xf32>
      %93 = arith.addf %92, %91 : vector<8x128xf32>
      %94 = arith.divf %92, %93 : vector<8x128xf32>
      %95 = vector.extract_strided_slice %77 {offsets = [0, 256], sizes = [8, 128], strides = [1, 1]} : vector<8x512xf32> to vector<8x128xf32>
      %96 = math.tanh %95 : vector<8x128xf32>
      %97 = vector.extract_strided_slice %77 {offsets = [0, 384], sizes = [8, 128], strides = [1, 1]} : vector<8x512xf32> to vector<8x128xf32>
      %98 = arith.negf %97 : vector<8x128xf32>
      %99 = math.exp %98 : vector<8x128xf32>
      %cst_70 = arith.constant 1.000000e+00 : f32
      %100 = vector.broadcast %cst_70 : f32 to vector<8x128xf32>
      %101 = arith.addf %100, %99 : vector<8x128xf32>
      %102 = arith.divf %100, %101 : vector<8x128xf32>
      %103 = arith.mulf %94, %arg25 : vector<8x128xf32>
      %104 = arith.mulf %88, %96 : vector<8x128xf32>
      %105 = arith.addf %103, %104 : vector<8x128xf32>
      %106 = math.tanh %105 : vector<8x128xf32>
      %107 = arith.mulf %102, %106 : vector<8x128xf32>
      %108 = vector.extract_strided_slice %82 {offsets = [0, 0], sizes = [8, 128], strides = [1, 1]} : vector<8x512xf32> to vector<8x128xf32>
      %109 = arith.negf %108 : vector<8x128xf32>
      %110 = math.exp %109 : vector<8x128xf32>
      %cst_71 = arith.constant 1.000000e+00 : f32
      %111 = vector.broadcast %cst_71 : f32 to vector<8x128xf32>
      %112 = arith.addf %111, %110 : vector<8x128xf32>
      %113 = arith.divf %111, %112 : vector<8x128xf32>
      %114 = vector.extract_strided_slice %82 {offsets = [0, 128], sizes = [8, 128], strides = [1, 1]} : vector<8x512xf32> to vector<8x128xf32>
      %115 = arith.negf %114 : vector<8x128xf32>
      %116 = math.exp %115 : vector<8x128xf32>
      %cst_72 = arith.constant 1.000000e+00 : f32
      %117 = vector.broadcast %cst_72 : f32 to vector<8x128xf32>
      %118 = arith.addf %117, %116 : vector<8x128xf32>
      %119 = arith.divf %117, %118 : vector<8x128xf32>
      %120 = vector.extract_strided_slice %82 {offsets = [0, 256], sizes = [8, 128], strides = [1, 1]} : vector<8x512xf32> to vector<8x128xf32>
      %121 = math.tanh %120 : vector<8x128xf32>
      %122 = vector.extract_strided_slice %82 {offsets = [0, 384], sizes = [8, 128], strides = [1, 1]} : vector<8x512xf32> to vector<8x128xf32>
      %123 = arith.negf %122 : vector<8x128xf32>
      %124 = math.exp %123 : vector<8x128xf32>
      %cst_73 = arith.constant 1.000000e+00 : f32
      %125 = vector.broadcast %cst_73 : f32 to vector<8x128xf32>
      %126 = arith.addf %125, %124 : vector<8x128xf32>
      %127 = arith.divf %125, %126 : vector<8x128xf32>
      %128 = arith.mulf %119, %arg27 : vector<8x128xf32>
      %129 = arith.mulf %113, %121 : vector<8x128xf32>
      %130 = arith.addf %128, %129 : vector<8x128xf32>
      %131 = math.tanh %130 : vector<8x128xf32>
      %132 = arith.mulf %127, %131 : vector<8x128xf32>
      %133 = arith.index_cast %69 : i32 to index
      %c0_74 = arith.constant 0 : index
      %134 = vector.load %arg20[%133, %c0_74] : memref<64x128xf32, #tpu.memory_space<vmem>>, vector<8x128xf32>
      tpu.vector_store %arg20[%133, %c0_74], %107 {strides = array<i32>} : memref<64x128xf32, #tpu.memory_space<vmem>>, vector<8x128xf32>,
      %135 = arith.index_cast %72 : i32 to index
      %c0_75 = arith.constant 0 : index
      %136 = vector.load %arg21[%135, %c0_75] : memref<64x128xf32, #tpu.memory_space<vmem>>, vector<8x128xf32>
      tpu.vector_store %arg21[%135, %c0_75], %132 {strides = array<i32>} : memref<64x128xf32, #tpu.memory_space<vmem>>, vector<8x128xf32>,
      scf.yield %107, %105, %132, %130 : vector<8x128xf32>, vector<8x128xf32>, vector<8x128xf32>, vector<8x128xf32>
    }
    %c8_i32_22 = arith.constant 8 : i32
    %c0_23 = arith.constant 0 : index
    %c0_24 = arith.constant 0 : index
    %23 = vector.load %arg20[%c0_23, %c0_24] : memref<64x128xf32, #tpu.memory_space<vmem>>, vector<64x128xf32>
    %c0_25 = arith.constant 0 : index
    %c0_26 = arith.constant 0 : index
    %24 = vector.load %arg21[%c0_25, %c0_26] : memref<64x128xf32, #tpu.memory_space<vmem>>, vector<64x128xf32>
    %25 = tpu.concatenate %23, %24 in 1 : vector<64x128xf32>, vector<64x128xf32> -> vector<64x256xf32>
    %c0_27 = arith.constant 0 : index
    %c0_28 = arith.constant 0 : index
    %26 = vector.load %arg11[%c0_27, %c0_28] : memref<256x5xf32, #tpu.memory_space<vmem>>, vector<256x5xf32>
    %cst_29 = arith.constant dense<0.000000e+00> : vector<64x5xf32>
    %27 = tpu.matmul %25, %26, %cst_29 {dimension_numbers = #tpu.dot_dimension_numbers<[1], [0], [0], [1], [0, 0, 1, 1], [], []>} : vector<64x256xf32>, vector<256x5xf32>, vector<64x5xf32> -> vector<64x5xf32>
    %c0_30 = arith.constant 0 : index
    %c0_31 = arith.constant 0 : index
    %28 = vector.load %arg12[%c0_30, %c0_31] : memref<1x5xf32, #tpu.memory_space<vmem>>, vector<1x5xf32>
    %29 = vector.broadcast %28 : vector<1x5xf32> to vector<64x5xf32>
    %30 = arith.addf %27, %29 : vector<64x5xf32>
    %c0_32 = arith.constant 0 : index
    %c0_33 = arith.constant 0 : index
    %31 = vector.load %arg16[%c0_32, %c0_33] : memref<64x5xf32, #tpu.memory_space<vmem>>, vector<64x5xf32>
    tpu.vector_store %arg16[%c0_32, %c0_33], %30 {strides = array<i32>} : memref<64x5xf32, #tpu.memory_space<vmem>>, vector<64x5xf32>,
    %c0_34 = arith.constant 0 : index
    %c0_35 = arith.constant 0 : index
    %32 = vector.load %arg15[%c0_34, %c0_35] : memref<5x5xf32, #tpu.memory_space<vmem>>, vector<5x5xf32>
    %c0_36 = arith.constant 0 : index
    %c0_37 = arith.constant 0 : index
    %33 = vector.load %arg2[%c0_36, %c0_37] : memref<8x1xi32, #tpu.memory_space<vmem>>, vector<8x1xi32>
    %34 = tpu.iota {dimensions = array<i32: 1>} : vector<8x5x5xi32>
    %35 = tpu.iota {dimensions = array<i32: 1>} : vector<1x5xi32>
    %36 = tpu.iota {dimensions = array<i32: 1>} : vector<1x8xi32>
    %c0_38 = arith.constant 0 : index
    %c0_39 = arith.constant 0 : index
    %37 = vector.load %arg13[%c0_38, %c0_39] : memref<1x5xf32, #tpu.memory_space<vmem>>, vector<1x5xf32>
    %c0_40 = arith.constant 0 : index
    %c0_41 = arith.constant 0 : index
    %38 = vector.load %arg16[%c0_40, %c0_41] : memref<64x5xf32, #tpu.memory_space<vmem>>, vector<8x5xf32>
    %39 = vector.broadcast %37 : vector<1x5xf32> to vector<8x5xf32>
    %40 = arith.addf %39, %38 : vector<8x5xf32>
    %c1_i32_42 = arith.constant 1 : i32
    %c7_i32 = arith.constant 7 : i32
    %41 = arith.addi %c1_i32_42, %c7_i32 : i32
    %c1_i32_43 = arith.constant 1 : i32
    %42 = scf.for %arg23 = %c1_i32_42 to %41 step %c1_i32_43 iter_args(%arg24 = %40) -> (vector<8x5xf32>)  : i32 {
      %c8_i32_57 = arith.constant 8 : i32
      %68 = arith.muli %arg23, %c8_i32_57 : i32
      %69 = tpu.assume_multiple %68, 8 : i32
      %70 = arith.index_cast %69 : i32 to index
      %c0_58 = arith.constant 0 : index
      %71 = vector.load %arg16[%70, %c0_58] : memref<64x5xf32, #tpu.memory_space<vmem>>, vector<8x5xf32>
      %72 = vector.shape_cast %arg24 : vector<8x5xf32> to vector<8x5x1xf32>
      %73 = vector.shape_cast %32 : vector<5x5xf32> to vector<1x5x5xf32>
      %74 = vector.broadcast %72 : vector<8x5x1xf32> to vector<8x5x5xf32>
      %75 = vector.broadcast %73 : vector<1x5x5xf32> to vector<8x5x5xf32>
      %76 = arith.addf %74, %75 : vector<8x5x5xf32>
      %77 = vector.shape_cast %71 : vector<8x5xf32> to vector<8x1x5xf32>
      %78 = vector.broadcast %77 : vector<8x1x5xf32> to vector<8x5x5xf32>
      %79 = arith.addf %76, %78 : vector<8x5x5xf32>
      %cst_59 = arith.constant dense<0xFF800000> : vector<8x5xf32>
      %80 = vector.multi_reduction <maximumf>, %79, %cst_59 [1] : vector<8x5x5xf32> to vector<8x5xf32>
      %81 = vector.shape_cast %80 : vector<8x5xf32> to vector<8x1x5xf32>
      %82 = vector.broadcast %81 : vector<8x1x5xf32> to vector<8x5x5xf32>
      %83 = arith.cmpf oge, %79, %82 : vector<8x5x5xf32>
      %c5_i32_60 = arith.constant 5 : i32
      %84 = vector.broadcast %c5_i32_60 : i32 to vector<8x5x5xi32>
      %85 = arith.select %83, %34, %84 : vector<8x5x5xi1>, vector<8x5x5xi32>
      %cst_61 = arith.constant dense<2147483647> : vector<8x5xi32>
      %86 = vector.multi_reduction <minsi>, %85, %cst_61 [1] : vector<8x5x5xi32> to vector<8x5xi32>
      %c1_i32_62 = arith.constant 1 : i32
      %87 = arith.subi %arg23, %c1_i32_62 : i32
      %c8_i32_63 = arith.constant 8 : i32
      %88 = arith.muli %87, %c8_i32_63 : i32
      %89 = tpu.assume_multiple %88, 8 : i32
      %90 = arith.index_cast %89 : i32 to index
      %c0_64 = arith.constant 0 : index
      %91 = vector.load %arg22[%90, %c0_64] : memref<56x5xi32, #tpu.memory_space<vmem>>, vector<8x5xi32>
      tpu.vector_store %arg22[%90, %c0_64], %86 {strides = array<i32>} : memref<56x5xi32, #tpu.memory_space<vmem>>, vector<8x5xi32>,
      %92 = vector.broadcast %arg23 : i32 to vector<8x1xi32>
      %93 = arith.cmpi sgt, %33, %92 : vector<8x1xi32>
      %94 = vector.shape_cast %93 : vector<8x1xi1> to vector<8x1xi1>
      %95 = vector.broadcast %94 : vector<8x1xi1> to vector<8x5xi1>
      %96 = arith.select %95, %80, %arg24 : vector<8x5xi1>, vector<8x5xf32>
      scf.yield %96 : vector<8x5xf32>
    }
    %c7_i32_44 = arith.constant 7 : i32
    %c0_45 = arith.constant 0 : index
    %c0_46 = arith.constant 0 : index
    %43 = vector.load %arg14[%c0_45, %c0_46] : memref<1x5xf32, #tpu.memory_space<vmem>>, vector<1x5xf32>
    %44 = vector.broadcast %43 : vector<1x5xf32> to vector<8x5xf32>
    %45 = arith.addf %42, %44 : vector<8x5xf32>
    %cst_47 = arith.constant dense<0xFF800000> : vector<8xf32>
    %46 = vector.multi_reduction <maximumf>, %45, %cst_47 [1] : vector<8x5xf32> to vector<8xf32>
    %47 = vector.shape_cast %46 : vector<8xf32> to vector<8x1xf32>
    %48 = vector.broadcast %47 : vector<8x1xf32> to vector<8x5xf32>
    %49 = arith.cmpf oge, %45, %48 : vector<8x5xf32>
    %c5_i32 = arith.constant 5 : i32
    %50 = vector.shape_cast %35 : vector<1x5xi32> to vector<1x5xi32>
    %51 = vector.broadcast %50 : vector<1x5xi32> to vector<8x5xi32>
    %52 = vector.broadcast %c5_i32 : i32 to vector<8x5xi32>
    %53 = arith.select %49, %51, %52 : vector<8x5xi1>, vector<8x5xi32>
    %cst_48 = arith.constant dense<2147483647> : vector<8xi32>
    %54 = vector.multi_reduction <minsi>, %53, %cst_48 [1] : vector<8x5xi32> to vector<8xi32>
    %55 = vector.shape_cast %54 : vector<8xi32> to vector<8x1xi32>
    %c1_i32_49 = arith.constant 1 : i32
    %56 = vector.broadcast %c1_i32_49 : i32 to vector<8x1xi32>
    %57 = arith.subi %33, %56 : vector<8x1xi32>
    %58 = vector.broadcast %36 : vector<1x8xi32> to vector<8x8xi32>
    %59 = vector.broadcast %57 : vector<8x1xi32> to vector<8x8xi32>
    %60 = arith.cmpi eq, %58, %59 : vector<8x8xi32>
    %c0_i32_50 = arith.constant 0 : i32
    %61 = vector.shape_cast %55 : vector<8x1xi32> to vector<8x1xi32>
    %62 = vector.broadcast %61 : vector<8x1xi32> to vector<8x8xi32>
    %63 = vector.broadcast %c0_i32_50 : i32 to vector<8x8xi32>
    %64 = arith.select %60, %62, %63 : vector<8x8xi1>, vector<8x8xi32>
    %c0_i32_51 = arith.constant 0 : i32
    %c7_i32_52 = arith.constant 7 : i32
    %65 = arith.addi %c0_i32_51, %c7_i32_52 : i32
    %c1_i32_53 = arith.constant 1 : i32
    %66:2 = scf.for %arg23 = %c0_i32_51 to %65 step %c1_i32_53 iter_args(%arg24 = %55, %arg25 = %64) -> (vector<8x1xi32>, vector<8x8xi32>)  : i32 {
      %c6_i32 = arith.constant 6 : i32
      %68 = arith.subi %c6_i32, %arg23 : i32
      %c8_i32_57 = arith.constant 8 : i32
      %69 = arith.muli %68, %c8_i32_57 : i32
      %70 = tpu.assume_multiple %69, 8 : i32
      %71 = arith.index_cast %70 : i32 to index
      %c0_58 = arith.constant 0 : index
      %72 = vector.load %arg22[%71, %c0_58] : memref<56x5xi32, #tpu.memory_space<vmem>>, vector<8x5xi32>
      %73 = vector.broadcast %35 : vector<1x5xi32> to vector<8x5xi32>
      %74 = vector.broadcast %arg24 : vector<8x1xi32> to vector<8x5xi32>
      %75 = arith.cmpi eq, %73, %74 : vector<8x5xi32>
      %c0_i32_59 = arith.constant 0 : i32
      %76 = vector.broadcast %c0_i32_59 : i32 to vector<8x5xi32>
      %77 = arith.select %75, %72, %76 : vector<8x5xi1>, vector<8x5xi32>
      %cst_60 = arith.constant dense<0> : vector<8xi32>
      %78 = vector.multi_reduction <add>, %77, %cst_60 [1] : vector<8x5xi32> to vector<8xi32>
      %79 = vector.shape_cast %78 : vector<8xi32> to vector<8x1xi32>
      %c1_i32_61 = arith.constant 1 : i32
      %80 = vector.broadcast %c1_i32_61 : i32 to vector<8x1xi32>
      %81 = arith.subi %33, %80 : vector<8x1xi32>
      %82 = vector.broadcast %68 : i32 to vector<8x1xi32>
      %83 = arith.cmpi slt, %82, %81 : vector<8x1xi32>
      %84 = arith.select %83, %79, %arg24 : vector<8x1xi1>, vector<8x1xi32>
      %85 = vector.broadcast %68 : i32 to vector<1x8xi32>
      %86 = arith.cmpi eq, %36, %85 : vector<1x8xi32>
      %87 = vector.broadcast %86 : vector<1x8xi1> to vector<8x8xi1>
      %88 = vector.broadcast %83 : vector<8x1xi1> to vector<8x8xi1>
      %89 = arith.andi %87, %88 : vector<8x8xi1>
      %90 = vector.shape_cast %84 : vector<8x1xi32> to vector<8x1xi32>
      %91 = vector.broadcast %90 : vector<8x1xi32> to vector<8x8xi32>
      %92 = arith.select %89, %91, %arg25 : vector<8x8xi1>, vector<8x8xi32>
      scf.yield %84, %92 : vector<8x1xi32>, vector<8x8xi32>
    }
    %c7_i32_54 = arith.constant 7 : i32
    %c0_55 = arith.constant 0 : index
    %c0_56 = arith.constant 0 : index
    %67 = vector.load %arg17[%c0_55, %c0_56] : memref<8x8xi32, #tpu.memory_space<vmem>>, vector<8x8xi32>
    tpu.vector_store %arg17[%c0_55, %c0_56], %66#1 {strides = array<i32>} : memref<8x8xi32, #tpu.memory_space<vmem>>, vector<8x8xi32>,
    return
  }
}

</mosaic_0001>

<bundles_post_ra>
// kernel: tpu_custom_call.1
= control target key start
LH: loop header
LB: loop body
LE: loop exit
PB: predicated region body
PF: predicated region fallthrough
CT: control target
= control target key end

     0   :  { %s2999_s0 = inlined_call_operand.vmem [shape: f32[64,64], index: 0, kind: input, shape index: {}]   ;;  %s3000_s1 = inlined_call_operand.vmem [shape: f32[64,32], index: 1, kind: input, shape index: {}]   ;;  %s3001_s2 = inlined_call_operand.vmem [shape: s32[8,1], index: 2, kind: input, shape index: {}]   ;;  %s3002_s3 = inlined_call_operand.vmem [shape: f32[32,64], index: 3, kind: input, shape index: {}]   ;;  %s3003_s4 = inlined_call_operand.vmem [shape: f32[1,64], index: 4, kind: input, shape index: {}]   ;;  %s3004_s5 = inlined_call_operand.hbm [shape: f32[128,512], index: 5, kind: input, shape index: {}]   ;;  %s3005_s6 = inlined_call_operand.hbm [shape: f32[128,512], index: 6, kind: input, shape index: {}]   ;;  %s3006_s7 = inlined_call_operand.vmem [shape: f32[1,512], index: 7, kind: input, shape index: {}]   ;;  %s3007_s8 = inlined_call_operand.hbm [shape: f32[128,512], index: 8, kind: input, shape index: {}]   ;;  %s3008_s9 = inlined_call_operand.hbm [shape: f32[128,512], index: 9, kind: input, shape index: {}]   ;;  %s3009_s10 = inlined_call_operand.vmem [shape: f32[1,512], index: 10, kind: input, shape index: {}]   ;;  %s3010_s11 = inlined_call_operand.vmem [shape: f32[256,5], index: 11, kind: input, shape index: {}]   ;;  %s3011_s12 = inlined_call_operand.vmem [shape: f32[1,5], index: 12, kind: input, shape index: {}]   ;;  %s3012_s13 = inlined_call_operand.vmem [shape: f32[1,5], index: 13, kind: input, shape index: {}]   ;;  %s3013_s14 = inlined_call_operand.vmem [shape: f32[1,5], index: 14, kind: input, shape index: {}]   ;;  %s3014_s15 = inlined_call_operand.vmem [shape: f32[5,5], index: 15, kind: input, shape index: {}]   ;;  %s3015_s16 = inlined_call_operand.vmem [shape: f32[64,5], index: 16, kind: output, shape index: {0}]   ;;  %s3016_s17 = inlined_call_operand.hbm [shape: s32[8,8], index: 17, kind: output, shape index: {1}]  }
   0x1   :  { %3019 = sst [smem:[#allocation20_spill]] %s2999_s0 }
   0x2   :  { %3020 = sst [smem:[#allocation21_spill]] %s3000_s1 }
   0x3   :  { %23 = vsyncpa [#allocation8], 0 }
   0x4   :  { %24 = vsyncpa [#allocation11], 0 }
   0x5   :  { %25 = vsyncpa [#allocation14], 0 }
   0x6   :  { %26 = vsyncpa [#allocation9], 0  ;;  %s54_s26 = sshll.u32 %s3005_s6, 4  ;;  %s2263_s27 = smov [#allocation10]   ;;  %s55_s26 = int_to_ptr.hbm [resolvable:$true] %s54_s26 }
   0x7   :  { %s56_s28 = sshll.u32 %s2263_s27, 4  ;;  %s41_s30 = sshll.u32 %s3004_s5, 4  ;;  %s57_s28 = int_to_ptr.vmem [resolvable:$true] %s56_s28  ;;  %s42_s30 = int_to_ptr.hbm [resolvable:$true] %s41_s30 }
   0x8   :  { %s2264_s18 = smov 512   ;;  %s2265_s19 = smov 32  }
   0x9   :  { %62 = dma.hbm_to_vmem [thread:$0]  %s55_s26, 8192, %s57_s28, [#allocation11], %s2264_s18, %s2264_s18, %s2265_s19  }
   0xa   :  { %s2266_s1 = smov [#allocation7]   ;;  %s69_s23 = sshll.u32 %s3007_s8, 4  ;;  %s70_s23 = int_to_ptr.hbm [resolvable:$true] %s69_s23 }
   0xb   :  { %s43_s20 = sshll.u32 %s2266_s1, 4  ;;  %s82_s25 = sshll.u32 %s3008_s9, 4  ;;  %s44_s20 = int_to_ptr.vmem [resolvable:$true] %s43_s20  ;;  %s83_s25 = int_to_ptr.hbm [resolvable:$true] %s82_s25 }
   0xc   :  { %49 = dma.hbm_to_vmem [thread:$0]  %s42_s30, 8192, %s44_s20, [#allocation8], %s2264_s18, %s2264_s18, %s2265_s19  }
   0xd   :  { %s2267_s27 = smov [#allocation12]   ;;  %s2268_s5 = smov [#allocation13]  }
   0xe   :  { %s71_s29 = sshll.u32 %s2267_s27, 4  ;;  %s84_s26 = sshll.u32 %s2268_s5, 4  ;;  %s72_s29 = int_to_ptr.vmem [resolvable:$true] %s71_s29  ;;  %s85_s26 = int_to_ptr.vmem [resolvable:$true] %s84_s26 }
   0xf   :  { %77 = dma.hbm_to_vmem [thread:$0]  %s70_s23, 8192, %s72_s29, [#allocation11], %s2264_s18, %s2264_s18, %s2265_s19  }
  0x10   :  { %90 = dma.hbm_to_vmem [thread:$0]  %s83_s25, 8192, %s85_s26, [#allocation14], %s2264_s18, %s2264_s18, %s2265_s19  }
  0x11   :  { %2215 = dma.done.wait [#allocation8], 8192  }
  0x12   :  { %2216 = vsyncadd [#allocation8], 4294959104 }
  0x13   :  { %2217 = dma.done.wait [#allocation11], 16384  }
  0x14   :  { %2218 = vsyncadd [#allocation11], 4294950912 }
  0x15   :  { %2219 = dma.done.wait [#allocation14], 8192  }
  0x16   :  { %2220 = vsyncadd [#allocation14], 4294959104  ;;  %v130_v0 = vld [vmem:[%s3002_s3 + $0x18] sm:$0xff]  ;;  %v129_v1 = vld [vmem:[%s3002_s3 + $0x10] sm:$0xff]  ;;  %s3021_s22 = sld [smem:[#allocation21_spill]]  ;;  %vm135_vm0 = vcmask 261120  }
  0x17   :  { %172 = vmatpush.msra.mxu0 %v130_v0  ;;  %1882 = vmatpush.msra.mxu1 %v130_v0  ;;  %v128_v2 = vld [vmem:[%s3002_s3 + $0x8] sm:$0xff]  ;;  %v127_v3 = vld [vmem:[%s3002_s3] sm:$0xff]  ;;  %s2269_s19 = smov 64   ;;  %v310_v17 = vld [vmem:[#allocation7 + $0x1e0] sm:$0xff]  ;;  %s3022_s21 = sld [smem:[#allocation20_spill]]  ;;  %vm241_vm1 = vcmask 523264  }
  0x18   :  { %v2423_v12 = vld [vmem:[%s3003_s4] ss:$0 sm:$0xff]  ;;  %v312_v19 = vld [vmem:[#allocation7 + $0x1f0] sm:$0xff]  ;;  %v313_v20 = vld [vmem:[#allocation7 + $0x1f8] sm:$0xff] }
  0x19   :  { %173 = vmatpush.msra.mxu0 %v129_v1  ;;  %1883 = vmatpush.msra.mxu1 %v129_v1  ;;  %v311_v18 = vld [vmem:[#allocation7 + $0x1e8] sm:$0xff]  ;;  %v306_v21 = vld [vmem:[#allocation7 + $0x1c0] sm:$0xff]  ;;  %v308_v23 = vld [vmem:[#allocation7 + $0x1d0] sm:$0xff] }
  0x1a   :  { %365 = vmatpush.msra.mxu2 %v311_v18  ;;  %v307_v22 = vld [vmem:[#allocation7 + $0x1c8] sm:$0xff]  ;;  %406 = vmatpush.msra.mxu3 %v312_v19  ;;  %v309_v24 = vld [vmem:[#allocation7 + $0x1d8] sm:$0xff]  ;;  %v302_v25 = vld [vmem:[#allocation7 + $0x1a0] sm:$0xff] }
  0x1b   :  { %174 = vmatpush.msra.mxu0 %v128_v2  ;;  %1884 = vmatpush.msra.mxu1 %v128_v2  ;;  %v303_v26 = vld [vmem:[#allocation7 + $0x1a8] sm:$0xff]  ;;  %v304_v27 = vld [vmem:[#allocation7 + $0x1b0] sm:$0xff]  ;;  %v305_v28 = vld [vmem:[#allocation7 + $0x1b8] sm:$0xff] }
  0x1c   :  { %v119_v4 = vld [vmem:[%s3021_s22] sm:$0xff]  ;;  %v120_v6 = vld [vmem:[%s3021_s22 + $0x8] sm:$0xff]  ;;  %v121_v8 = vld [vmem:[%s3021_s22 + $0x10] sm:$0xff]  ;;  %366 = vmatpush.msra.mxu2 %v307_v22  ;;  %407 = vmatpush.msra.mxu3 %v308_v23 }
  0x1d   :  { %v123_v5 = vld [vmem:[%s3021_s22 + $0x20] sm:$0xff]  ;;  %175 = vmatpush.msra.mxu0 %v127_v3  ;;  %1885 = vmatpush.msra.mxu1 %v127_v3  ;;  %v124_v7 = vld [vmem:[%s3021_s22 + $0x28] sm:$0xff]  ;;  %v125_v9 = vld [vmem:[%s3021_s22 + $0x30] sm:$0xff] }
  0x1e   :  { %1855 = vmatmul.msk.f32.vlgmr.msra.gmra.mxu0 %vm135_vm0, %v119_v4  ;;  %1859 = vmatmul.msk.f32.vlgmr.msra.gmra.mxu1 %vm135_vm0, %v123_v5  ;;  %v122_v10 = vld [vmem:[%s3021_s22 + $0x18] sm:$0xff]  ;;  %v299_v30 = vld [vmem:[#allocation7 + $0x188] sm:$0xff]  ;;  %v300_v35 = vld [vmem:[#allocation7 + $0x190] sm:$0xff] }
  0x1f   :  { %v126_v11 = vld [vmem:[%s3021_s22 + $0x38] sm:$0xff]  ;;  %324 = vmatpush.msrb.mxu1 %v310_v17  ;;  %447 = vmatpush.msrb.mxu0 %v313_v20  ;;  %v301_v36 = vld [vmem:[#allocation7 + $0x198] sm:$0xff]  ;;  %v295_v38 = vld [vmem:[#allocation7 + $0x168] sm:$0xff] }
  0x20   :  { %v298_v29 = vld [vmem:[#allocation7 + $0x180] sm:$0xff]  ;;  %367 = vmatpush.msra.mxu2 %v303_v26  ;;  %408 = vmatpush.msra.mxu3 %v304_v27  ;;  %v296_v39 = vld [vmem:[#allocation7 + $0x170] sm:$0xff]  ;;  %v297_v40 = vld [vmem:[#allocation7 + $0x178] sm:$0xff] }
  0x21   :  { %325 = vmatpush.msrb.mxu1 %v306_v21  ;;  %448 = vmatpush.msrb.mxu0 %v309_v24  ;;  %v294_v37 = vld [vmem:[#allocation7 + $0x160] sm:$0xff]  ;;  %v291_v42 = vld [vmem:[#allocation7 + $0x148] sm:$0xff]  ;;  %v292_v43 = vld [vmem:[#allocation7 + $0x150] sm:$0xff] }
  0x22   :  { %368 = vmatpush.msra.mxu2 %v299_v30  ;;  %409 = vmatpush.msra.mxu3 %v300_v35  ;;  %v290_v41 = vld [vmem:[#allocation7 + $0x140] sm:$0xff]  ;;  %v293_v44 = vld [vmem:[#allocation7 + $0x158] sm:$0xff]  ;;  %v287_v46 = vld [vmem:[#allocation7 + $0x128] sm:$0xff] }
  0x23   :  { %326 = vmatpush.msrb.mxu1 %v302_v25  ;;  %449 = vmatpush.msrb.mxu0 %v305_v28  ;;  %v286_v45 = vld [vmem:[#allocation7 + $0x120] sm:$0xff]  ;;  %v288_v47 = vld [vmem:[#allocation7 + $0x130] sm:$0xff]  ;;  %v289_v48 = vld [vmem:[#allocation7 + $0x138] sm:$0xff] }
  0x24   :  { %369 = vmatpush.msra.mxu2 %v295_v38  ;;  %410 = vmatpush.msra.mxu3 %v296_v39  ;;  %v282_v53 = vld [vmem:[#allocation7 + $0x100] sm:$0xff]  ;;  %v283_v54 = vld [vmem:[#allocation7 + $0x108] sm:$0xff]  ;;  %v284_v55 = vld [vmem:[#allocation7 + $0x110] sm:$0xff] }
  0x25   :  { %327 = vmatpush.msrb.mxu1 %v298_v29  ;;  %450 = vmatpush.msrb.mxu0 %v301_v36  ;;  %v285_v56 = vld [vmem:[#allocation7 + $0x118] sm:$0xff]  ;;  %v278_v57 = vld [vmem:[#allocation7 + $0xe0] sm:$0xff]  ;;  %v279_v58 = vld [vmem:[#allocation7 + $0xe8] sm:$0xff] }
  0x26   :  { %1856 = vmatmul.msk.f32.gmra.mxu0 %vm135_vm0, %v120_v6  ;;  %1860 = vmatmul.msk.f32.gmra.mxu1 %vm135_vm0, %v124_v7  ;;  %v280_v59 = vld [vmem:[#allocation7 + $0xf0] sm:$0xff]  ;;  %v281_v60 = vld [vmem:[#allocation7 + $0xf8] sm:$0xff]  ;;  %v274_v61 = vld [vmem:[#allocation7 + $0xc0] sm:$0xff] }
  0x27   :  { %328 = vmatpush.msrb.mxu1 %v294_v37  ;;  %451 = vmatpush.msrb.mxu0 %v297_v40  ;;  %v275_v62 = vld [vmem:[#allocation7 + $0xc8] sm:$0xff]  ;;  %v276_v63 = vld [vmem:[#allocation7 + $0xd0] sm:$0xff]  ;;  %v277_v0 = vld [vmem:[#allocation7 + $0xd8] sm:$0xff] }
  0x28   :  { %370 = vmatpush.msra.mxu2 %v291_v42  ;;  %411 = vmatpush.msra.mxu3 %v292_v43  ;;  %v270_v1 = vld [vmem:[#allocation7 + $0xa0] sm:$0xff]  ;;  %v271_v2 = vld [vmem:[#allocation7 + $0xa8] sm:$0xff]  ;;  %v272_v4 = vld [vmem:[#allocation7 + $0xb0] sm:$0xff] }
  0x29   :  { %329 = vmatpush.msrb.mxu1 %v290_v41  ;;  %452 = vmatpush.msrb.mxu0 %v293_v44  ;;  %v273_v6 = vld [vmem:[#allocation7 + $0xb8] sm:$0xff]  ;;  %v266_v7 = vld [vmem:[#allocation7 + $0x80] sm:$0xff]  ;;  %v259_v18 = vld [vmem:[#allocation7 + $0x48] sm:$0xff] }
  0x2a   :  { %371 = vmatpush.msra.mxu2 %v287_v46  ;;  %412 = vmatpush.msra.mxu3 %v288_v47  ;;  %v258_v17 = vld [vmem:[#allocation7 + $0x40] sm:$0xff]  ;;  %v260_v19 = vld [vmem:[#allocation7 + $0x50] sm:$0xff]  ;;  %v261_v21 = vld [vmem:[#allocation7 + $0x58] sm:$0xff] }
  0x2b   :  { %330 = vmatpush.msrb.mxu1 %v286_v45  ;;  %453 = vmatpush.msrb.mxu0 %v289_v48  ;;  %v254_v22 = vld [vmem:[#allocation7 + $0x20] sm:$0xff]  ;;  %v255_v23 = vld [vmem:[#allocation7 + $0x28] sm:$0xff]  ;;  %v256_v24 = vld [vmem:[#allocation7 + $0x30] sm:$0xff] }
  0x2c   :  { %372 = vmatpush.msra.mxu2 %v283_v54  ;;  %413 = vmatpush.msra.mxu3 %v284_v55  ;;  %v257_v25 = vld [vmem:[#allocation7 + $0x38] sm:$0xff]  ;;  %v250_v26 = vld [vmem:[#allocation7] sm:$0xff]  ;;  %v252_v27 = vld [vmem:[#allocation7 + $0x10] sm:$0xff] }
  0x2d   :  { %331 = vmatpush.msrb.mxu1 %v282_v53  ;;  %454 = vmatpush.msrb.mxu0 %v285_v56  ;;  %v253_v28 = vld [vmem:[#allocation7 + $0x18] sm:$0xff]  ;;  %v581_v29 = vld [vmem:[#allocation12 + $0x1e8] sm:$0xff]  ;;  %v582_v30 = vld [vmem:[#allocation12 + $0x1f0] sm:$0xff] }
  0x2e   :  { %1857 = vmatmul.msk.f32.gmra.mxu0 %vm135_vm0, %v121_v8  ;;  %1861 = vmatmul.msk.f32.gmra.mxu1 %vm135_vm0, %v125_v9  ;;  %v267_v8 = vld [vmem:[#allocation7 + $0x88] sm:$0xff]  ;;  %v268_v9 = vld [vmem:[#allocation7 + $0x90] sm:$0xff]  ;;  %v576_v37 = vld [vmem:[#allocation12 + $0x1c0] sm:$0xff] }
  0x2f   :  { %332 = vmatpush.msrb.mxu1 %v278_v57  ;;  %373 = vmatpush.msra.mxu2 %v279_v58  ;;  %v573_v35 = vld [vmem:[#allocation12 + $0x1a8] sm:$0xff]  ;;  %v574_v36 = vld [vmem:[#allocation12 + $0x1b0] sm:$0xff]  ;;  %v579_v38 = vld [vmem:[#allocation12 + $0x1d8] sm:$0xff] }
  0x30   :  { %414 = vmatpush.msra.mxu3 %v280_v59  ;;  %455 = vmatpush.msrb.mxu0 %v281_v60  ;;  %v569_v39 = vld [vmem:[#allocation12 + $0x188] sm:$0xff]  ;;  %v570_v40 = vld [vmem:[#allocation12 + $0x190] sm:$0xff]  ;;  %v572_v41 = vld [vmem:[#allocation12 + $0x1a0] sm:$0xff] }
  0x31   :  { %333 = vmatpush.msrb.mxu1 %v274_v61  ;;  %374 = vmatpush.msra.mxu2 %v275_v62  ;;  %v575_v42 = vld [vmem:[#allocation12 + $0x1b8] sm:$0xff]  ;;  %v565_v43 = vld [vmem:[#allocation12 + $0x168] sm:$0xff]  ;;  %v566_v44 = vld [vmem:[#allocation12 + $0x170] sm:$0xff] }
  0x32   :  { %415 = vmatpush.msra.mxu3 %v276_v63  ;;  %456 = vmatpush.msrb.mxu0 %v277_v0  ;;  %v568_v45 = vld [vmem:[#allocation12 + $0x180] sm:$0xff]  ;;  %v571_v46 = vld [vmem:[#allocation12 + $0x198] sm:$0xff]  ;;  %v561_v47 = vld [vmem:[#allocation12 + $0x148] sm:$0xff] }
  0x33   :  { %334 = vmatpush.msrb.mxu1 %v270_v1  ;;  %375 = vmatpush.msra.mxu2 %v271_v2  ;;  %v562_v48 = vld [vmem:[#allocation12 + $0x150] sm:$0xff]  ;;  %v560_v53 = vld [vmem:[#allocation12 + $0x140] sm:$0xff]  ;;  %v563_v54 = vld [vmem:[#allocation12 + $0x158] sm:$0xff] }
  0x34   :  { %416 = vmatpush.msra.mxu3 %v272_v4  ;;  %457 = vmatpush.msrb.mxu0 %v273_v6  ;;  %v553_v55 = vld [vmem:[#allocation12 + $0x108] sm:$0xff]  ;;  %v554_v56 = vld [vmem:[#allocation12 + $0x110] sm:$0xff]  ;;  %v556_v57 = vld [vmem:[#allocation12 + $0x120] sm:$0xff] }
  0x35   :  { %335 = vmatpush.msrb.mxu1 %v266_v7  ;;  %376 = vmatpush.msra.mxu2 %v267_v8  ;;  %v559_v58 = vld [vmem:[#allocation12 + $0x138] sm:$0xff]  ;;  %v201_v59 = vld [vmem:[%s3022_s21] sm:$0xff]  ;;  %v550_v63 = vld [vmem:[#allocation12 + $0xf0] sm:$0xff] }
  0x36   :  { %1858 = vmatmul.msk.f32.gmra.mxu0 %vm135_vm0, %v122_v10  ;;  %1862 = vmatmul.msk.f32.gmra.mxu1 %vm135_vm0, %v126_v11  ;;  %v269_v10 = vld [vmem:[#allocation7 + $0x98] sm:$0xff]  ;;  %v262_v11 = vld [vmem:[#allocation7 + $0x60] sm:$0xff]  ;;  %v549_v62 = vld [vmem:[#allocation12 + $0xe8] sm:$0xff] }
  0x37   :  { %417 = vmatpush.msra.mxu3 %v268_v9  ;;  %458 = vmatpush.msrb.mxu0 %v269_v10  ;;  %v552_v0 = vld [vmem:[#allocation12 + $0x100] sm:$0xff]  ;;  %v555_v1 = vld [vmem:[#allocation12 + $0x118] sm:$0xff]  ;;  %v545_v2 = vld [vmem:[#allocation12 + $0xc8] sm:$0xff] }
  0x38   :  { %336 = vmatpush.msrb.mxu1 %v262_v11  ;;  %v548_v4 = vld [vmem:[#allocation12 + $0xe0] sm:$0xff]  ;;  %v202_v6 = vld [vmem:[%s3022_s21 + $0x8] sm:$0xff]  ;;  %v541_v9 = vld [vmem:[#allocation12 + $0xa8] sm:$0xff] }
  0x39   :  { %v542_v10 = vld [vmem:[#allocation12 + $0xb0] sm:$0xff]  ;;  %v544_v11 = vld [vmem:[#allocation12 + $0xc0] sm:$0xff] }
  0x3a   :  { %337 = vmatpush.msrb.mxu1 %v258_v17  ;;  %v543_v17 = vld [vmem:[#allocation12 + $0xb8] sm:$0xff] }
  0x3c   :  { %338 = vmatpush.msrb.mxu1 %v254_v22  ;;  %v534_v22 = vld [vmem:[#allocation12 + $0x70] sm:$0xff] }
  0x3e   :  { %339 = vmatpush.msrb.mxu1 %v250_v26  ;;  %v530_v26 = vld [vmem:[#allocation12 + $0x50] sm:$0xff] }
  0x9b   :  { %v177_v13 = vpop.f32.mrf.mxu0  ;;  %v189_v14 = vpop.f32.mrf.mxu1 }
  0x9c   :  { %v178_v15 = vadd.f32 %v2423_v12, %v177_v13  ;;  %v190_v16 = vadd.f32 %v2423_v12, %v189_v14  ;;  %v263_v14 = vld [vmem:[#allocation7 + $0x68] sm:$0xff] }
  0x9d   :  { %377 = vmatpush.msra.mxu2 %v263_v14  ;;  %v537_v14 = vld [vmem:[#allocation12 + $0x88] sm:$0xff] }
  0x9e   :  { %217 = vrot.lane.b32.xlu0 %v178_v15, %s2269_s19  ;;  %225 = vrot.lane.b32.xlu2 %v190_v16, %s2269_s19  ;;  %v264_v15 = vld [vmem:[#allocation7 + $0x70] sm:$0xff]  ;;  %v265_v16 = vld [vmem:[#allocation7 + $0x78] sm:$0xff] }
  0x9f   :  { %418 = vmatpush.msra.mxu3 %v264_v15  ;;  %459 = vmatpush.msrb.mxu0 %v265_v16  ;;  %v538_v15 = vld [vmem:[#allocation12 + $0x90] sm:$0xff]  ;;  %v540_v16 = vld [vmem:[#allocation12 + $0xa0] sm:$0xff] }
  0xa0   :  { %378 = vmatpush.msra.mxu2 %v259_v18  ;;  %v203_v18 = vld [vmem:[%s3022_s21 + $0x10] sm:$0xff] }
  0xa1   :  { %419 = vmatpush.msra.mxu3 %v260_v19  ;;  %460 = vmatpush.msrb.mxu0 %v261_v21  ;;  %v533_v21 = vld [vmem:[#allocation12 + $0x68] sm:$0xff] }
  0xa2   :  { %379 = vmatpush.msra.mxu2 %v255_v23  ;;  %v536_v23 = vld [vmem:[#allocation12 + $0x80] sm:$0xff] }
  0xa3   :  { %v180_v31 = vpop.f32.mrf.mxu0  ;;  %v192_v32 = vpop.f32.mrf.mxu1  ;;  %420 = vmatpush.msra.mxu3 %v256_v24  ;;  %461 = vmatpush.msrb.mxu0 %v257_v25  ;;  %v539_v24 = vld [vmem:[#allocation12 + $0x98] sm:$0xff]  ;;  %v529_v25 = vld [vmem:[#allocation12 + $0x48] sm:$0xff] }
  0xa4   :  { %v181_v33 = vadd.f32 %v2423_v12, %v180_v31  ;;  %v193_v34 = vadd.f32 %v2423_v12, %v192_v32  ;;  %v577_v31 = vld [vmem:[#allocation12 + $0x1c8] sm:$0xff]  ;;  %v578_v32 = vld [vmem:[#allocation12 + $0x1d0] sm:$0xff] }
  0xa5   :  { %421 = vmatpush.msra.mxu3 %v252_v27  ;;  %462 = vmatpush.msrb.mxu0 %v253_v28  ;;  %v535_v27 = vld [vmem:[#allocation12 + $0x78] sm:$0xff]  ;;  %v204_v28 = vld [vmem:[%s3022_s21 + $0x18] sm:$0xff] }
  0xa6   :  { %219 = vrot.lane.b32.xlu0 %v181_v33, %s2269_s19  ;;  %227 = vrot.lane.b32.xlu2 %v193_v34, %s2269_s19  ;;  %v580_v33 = vld [vmem:[#allocation12 + $0x1e0] sm:$0xff]  ;;  %v583_v34 = vld [vmem:[#allocation12 + $0x1f8] sm:$0xff] }
  0xa7   :  { %676 = vmatpush.msrb.mxu3 %v582_v30  ;;  %594 = vmatpush.msra.mxu1 %v580_v33  ;;  %v528_v33 = vld [vmem:[#allocation12 + $0x40] sm:$0xff] }
  0xa8   :  { %717 = vmatpush.msra.mxu0 %v583_v34 }
  0xa9   :  { %677 = vmatpush.msrb.mxu3 %v578_v32  ;;  %595 = vmatpush.msra.mxu1 %v576_v37  ;;  %v526_v32 = vld [vmem:[#allocation12 + $0x30] sm:$0xff] }
  0xaa   :  { %718 = vmatpush.msra.mxu0 %v579_v38  ;;  %v522_v37 = vld [vmem:[#allocation12 + $0x10] sm:$0xff]  ;;  %v524_v38 = vld [vmem:[#allocation12 + $0x20] sm:$0xff] }
  0xab   :  { %v183_v49 = vpop.f32.mrf.mxu0  ;;  %v195_v50 = vpop.f32.mrf.mxu1  ;;  %678 = vmatpush.msrb.mxu3 %v574_v36  ;;  %596 = vmatpush.msra.mxu1 %v572_v41  ;;  %v521_v36 = vld [vmem:[#allocation12 + $0x8] sm:$0xff]  ;;  %v520_v41 = vld [vmem:[#allocation12] sm:$0xff] }
  0xac   :  { %v184_v51 = vadd.f32 %v2423_v12, %v183_v49  ;;  %v196_v52 = vadd.f32 %v2423_v12, %v195_v50  ;;  %719 = vmatpush.msra.mxu0 %v575_v42  ;;  %v564_v49 = vld [vmem:[#allocation12 + $0x160] sm:$0xff]  ;;  %v567_v50 = vld [vmem:[#allocation12 + $0x178] sm:$0xff] }
  0xad   :  { %679 = vmatpush.msrb.mxu3 %v570_v40  ;;  %597 = vmatpush.msra.mxu1 %v568_v45  ;;  %v205_v40 = vld [vmem:[%s3022_s21 + $0x20] sm:$0xff]  ;;  %v523_v42 = vld [vmem:[#allocation12 + $0x18] sm:$0xff] }
  0xae   :  { %221 = vrot.lane.b32.xlu1 %v184_v51, %s2269_s19  ;;  %229 = vrot.lane.b32.xlu0 %v196_v52, %s2269_s19  ;;  %v557_v51 = vld [vmem:[#allocation12 + $0x128] sm:$0xff]  ;;  %v558_v52 = vld [vmem:[#allocation12 + $0x130] sm:$0xff] }
  0xaf   :  { %680 = vmatpush.msrb.mxu3 %v566_v44  ;;  %720 = vmatpush.msra.mxu0 %v571_v46  ;;  %v206_v44 = vld [vmem:[%s3022_s21 + $0x28] sm:$0xff] }
  0xb0   :  { %598 = vmatpush.msra.mxu1 %v564_v49 }
  0xb1   :  { %681 = vmatpush.msrb.mxu3 %v562_v48  ;;  %721 = vmatpush.msra.mxu0 %v567_v50  ;;  %v208_v50 = vld [vmem:[%s3022_s21 + $0x38] sm:$0xff] }
  0xb2   :  { %599 = vmatpush.msra.mxu1 %v560_v53  ;;  %v314_v53 = vld [vmem:[%s3006_s7] sm:$0xf] }
  0xb3   :  { %v186_v3 = vpop.f32.mrf.mxu0  ;;  %v198_v13 = vpop.f32.mrf.mxu1  ;;  %682 = vmatpush.msrb.mxu3 %v558_v52  ;;  %722 = vmatpush.msra.mxu0 %v563_v54  ;;  %v2516_v54 = vperm.slane %v314_v53, 0 }
  0xb4   :  { %v187_v5 = vadd.f32 %v2423_v12, %v186_v3  ;;  %v199_v20 = vadd.f32 %v2423_v12, %v198_v13  ;;  %v251_v12 = vld [vmem:[#allocation7 + $0x8] sm:$0xff]  ;;  %600 = vmatpush.msra.mxu1 %v556_v57  ;;  %v546_v3 = vld [vmem:[#allocation12 + $0xd0] sm:$0xff]  ;;  %v547_v13 = vld [vmem:[#allocation12 + $0xd8] sm:$0xff] }
  0xb5   :  { %380 = vmatpush.msra.mxu2 %v251_v12  ;;  %683 = vmatpush.msrb.mxu3 %v554_v56  ;;  %v532_v12 = vld [vmem:[#allocation12 + $0x60] sm:$0xff] }
  0xb6   :  { %223 = vrot.lane.b32.xlu1 %v187_v5, %s2269_s19  ;;  %723 = vmatpush.msra.mxu0 %v559_v58  ;;  %v551_v5 = vld [vmem:[#allocation12 + $0xf8] sm:$0xff] }
  0xb7   :  { %635 = vmatpush.msrb.mxu2 %v581_v29  ;;  %684 = vmatpush.msrb.mxu3 %v550_v63 }
  0xb8   :  { %601 = vmatpush.msra.mxu1 %v552_v0  ;;  %724 = vmatpush.msra.mxu0 %v555_v1 }
  0xb9   :  { %636 = vmatpush.msrb.mxu2 %v577_v31  ;;  %685 = vmatpush.msrb.mxu3 %v546_v3  ;;  %v525_v31 = vld [vmem:[#allocation12 + $0x28] sm:$0xff] }
  0xba   :  { %602 = vmatpush.msra.mxu1 %v548_v4  ;;  %725 = vmatpush.msra.mxu0 %v551_v5 }
  0xbb   :  { %637 = vmatpush.msrb.mxu2 %v573_v35  ;;  %686 = vmatpush.msrb.mxu3 %v542_v10  ;;  %v531_v35 = vld [vmem:[#allocation12 + $0x58] sm:$0xff] }
  0xbc   :  { %603 = vmatpush.msra.mxu1 %v544_v11  ;;  %726 = vmatpush.msra.mxu0 %v547_v13 }
  0xbd   :  { %638 = vmatpush.msrb.mxu2 %v569_v39  ;;  %687 = vmatpush.msrb.mxu3 %v538_v15  ;;  %v527_v39 = vld [vmem:[#allocation12 + $0x38] sm:$0xff] }
  0xbe   :  { %231 = vrot.lane.b32.xlu1 %v199_v20, %s2269_s19  ;;  %604 = vmatpush.msra.mxu1 %v540_v16 }
  0xbf   :  { %639 = vmatpush.msrb.mxu2 %v565_v43  ;;  %727 = vmatpush.msra.mxu0 %v543_v17 }
  0xc0   :  { %688 = vmatpush.msrb.mxu3 %v534_v22  ;;  %605 = vmatpush.msra.mxu1 %v536_v23 }
  0xc1   :  { %640 = vmatpush.msrb.mxu2 %v561_v47  ;;  %728 = vmatpush.msra.mxu0 %v539_v24  ;;  %v207_v47 = vld [vmem:[%s3022_s21 + $0x30] sm:$0xff] }
  0xc2   :  { %689 = vmatpush.msrb.mxu3 %v530_v26  ;;  %606 = vmatpush.msra.mxu1 %v532_v12 }
  0xc3   :  { %641 = vmatpush.msrb.mxu2 %v557_v51  ;;  %729 = vmatpush.msra.mxu0 %v535_v27 }
  0xc4   :  { %690 = vmatpush.msrb.mxu3 %v526_v32  ;;  %607 = vmatpush.msra.mxu1 %v528_v33 }
  0xc5   :  { %642 = vmatpush.msrb.mxu2 %v553_v55  ;;  %730 = vmatpush.msra.mxu0 %v531_v35  ;;  %v2518_v55 = vperm.slane %v314_v53, 3 }
  0xc6   :  { %691 = vmatpush.msrb.mxu3 %v522_v37  ;;  %608 = vmatpush.msra.mxu1 %v524_v38 }
  0xc7   :  { %643 = vmatpush.msrb.mxu2 %v549_v62  ;;  %731 = vmatpush.msra.mxu0 %v527_v39 }
  0xc8   :  { %609 = vmatpush.msra.mxu1 %v520_v41 }
  0xc9   :  { %644 = vmatpush.msrb.mxu2 %v545_v2  ;;  %732 = vmatpush.msra.mxu0 %v523_v42 }
  0xcb   :  { %645 = vmatpush.msrb.mxu2 %v541_v9 }
  0xcd   :  { %646 = vmatpush.msrb.mxu2 %v537_v14 }
  0xcf   :  { %647 = vmatpush.msrb.mxu2 %v533_v21 }
  0xd1   :  { %648 = vmatpush.msrb.mxu2 %v529_v25 }
  0xd3   :  { %649 = vmatpush.msrb.mxu2 %v525_v31 }
  0xd5   :  { %650 = vmatpush.msrb.mxu2 %v521_v36 }
  0xf8   :  { %v226_v34 = vpop.permute.xlu2 %225 }
  0xf9   :  { %v246_v43 = vsel %vm241_vm1, %v205_v40, %v226_v34 }
 0x100   :  { %v228_v45 = vpop.permute.xlu2 %227 }
 0x101   :  { %v247_v46 = vsel %vm241_vm1, %v206_v44, %v228_v45 }
 0x110   :  { %v218_v60 = vpop.permute.xlu0 %217 }
 0x111   :  { %v2445_v61 = vsel %vm241_vm1, %v201_v59, %v218_v60  ;;  %v2522_v60 = vperm.slane %v314_v53, 1 }
 0x112   :  { %340 = vmatmul.f32.vlgmr.msrb.gmra.mxu1 %v2445_v61  ;;  %381 = vmatmul.f32.vlgmr.msra.gmra.mxu2 %v2445_v61 }
 0x113   :  { %422 = vmatmul.f32.vlgmr.msra.gmra.mxu3 %v2445_v61  ;;  %463 = vmatmul.f32.vlgmr.msrb.gmra.mxu0 %v2445_v61 }
 0x118   :  { %v220_v7 = vpop.permute.xlu0 %219 }
 0x119   :  { %v2455_v8 = vsel %vm241_vm1, %v202_v6, %v220_v7 }
 0x11a   :  { %343 = vmatmul.f32.gmra.mxu1 %v2455_v8  ;;  %384 = vmatmul.f32.gmra.mxu2 %v2455_v8 }
 0x11b   :  { %425 = vmatmul.f32.gmra.mxu3 %v2455_v8  ;;  %466 = vmatmul.f32.gmra.mxu0 %v2455_v8 }
 0x120   :  { %v222_v19 = vpop.permute.xlu1 %221  ;;  %v230_v48 = vpop.permute.xlu0 %229 }
 0x121   :  { %v2465_v20 = vsel %vm241_vm1, %v203_v18, %v222_v19  ;;  %v248_v49 = vsel %vm241_vm1, %v207_v47, %v230_v48 }
 0x122   :  { %346 = vmatmul.f32.gmra.mxu1 %v2465_v20  ;;  %387 = vmatmul.f32.gmra.mxu2 %v2465_v20 }
 0x123   :  { %428 = vmatmul.f32.gmra.mxu3 %v2465_v20  ;;  %469 = vmatmul.f32.gmra.mxu0 %v2465_v20 }
 0x128   :  { %v224_v29 = vpop.permute.xlu1 %223 }
 0x129   :  { %v2475_v30 = vsel %vm241_vm1, %v204_v28, %v224_v29 }
 0x12a   :  { %349 = vmatmul.f32.gmra.mxu1 %v2475_v30  ;;  %390 = vmatmul.f32.gmra.mxu2 %v2475_v30 }
 0x12b   :  { %431 = vmatmul.f32.gmra.mxu3 %v2475_v30  ;;  %472 = vmatmul.f32.gmra.mxu0 %v2475_v30 }
 0x130   :  { %v232_v51 = vpop.permute.xlu1 %231 }
 0x131   :  { %v249_v52 = vsel %vm241_vm1, %v208_v50, %v232_v51 }
 0x132   :  { %352 = vmatmul.f32.gmra.mxu1 %v246_v43  ;;  %393 = vmatmul.f32.gmra.mxu2 %v246_v43 }
 0x133   :  { %434 = vmatmul.f32.gmra.mxu3 %v246_v43  ;;  %475 = vmatmul.f32.gmra.mxu0 %v246_v43 }
 0x13a   :  { %355 = vmatmul.f32.gmra.mxu1 %v247_v46  ;;  %396 = vmatmul.f32.gmra.mxu2 %v247_v46 }
 0x13b   :  { %437 = vmatmul.f32.gmra.mxu3 %v247_v46  ;;  %478 = vmatmul.f32.gmra.mxu0 %v247_v46 }
 0x142   :  { %358 = vmatmul.f32.gmra.mxu1 %v248_v49  ;;  %399 = vmatmul.f32.gmra.mxu2 %v248_v49 }
 0x143   :  { %440 = vmatmul.f32.gmra.mxu3 %v248_v49  ;;  %481 = vmatmul.f32.gmra.mxu0 %v248_v49 }
 0x14a   :  { %361 = vmatmul.f32.gmra.mxu1 %v249_v52  ;;  %402 = vmatmul.f32.gmra.mxu2 %v249_v52 }
 0x14b   :  { %443 = vmatmul.f32.gmra.mxu3 %v249_v52  ;;  %484 = vmatmul.f32.gmra.mxu0 %v249_v52 }
 0x152   :  { %610 = vmatmul.f32.vlgmr.msra.gmra.mxu1 %v2445_v61  ;;  %651 = vmatmul.f32.vlgmr.msrb.gmra.mxu2 %v2445_v61 }
 0x153   :  { %692 = vmatmul.f32.vlgmr.msrb.gmra.mxu3 %v2445_v61  ;;  %733 = vmatmul.f32.vlgmr.msra.gmra.mxu0 %v2445_v61  ;;  %v2524_v61 = vperm.slane %v314_v53, 2 }
 0x15a   :  { %613 = vmatmul.f32.gmra.mxu1 %v2455_v8  ;;  %654 = vmatmul.f32.gmra.mxu2 %v2455_v8 }
 0x15b   :  { %695 = vmatmul.f32.gmra.mxu3 %v2455_v8  ;;  %736 = vmatmul.f32.gmra.mxu0 %v2455_v8 }
 0x162   :  { %616 = vmatmul.f32.gmra.mxu1 %v2465_v20  ;;  %657 = vmatmul.f32.gmra.mxu2 %v2465_v20 }
 0x163   :  { %698 = vmatmul.f32.gmra.mxu3 %v2465_v20  ;;  %739 = vmatmul.f32.gmra.mxu0 %v2465_v20 }
 0x16a   :  { %619 = vmatmul.f32.gmra.mxu1 %v2475_v30  ;;  %660 = vmatmul.f32.gmra.mxu2 %v2475_v30 }
 0x16b   :  { %701 = vmatmul.f32.gmra.mxu3 %v2475_v30  ;;  %742 = vmatmul.f32.gmra.mxu0 %v2475_v30 }
 0x172   :  { %622 = vmatmul.f32.gmra.mxu1 %v246_v43  ;;  %663 = vmatmul.f32.gmra.mxu2 %v246_v43 }
 0x173   :  { %704 = vmatmul.f32.gmra.mxu3 %v246_v43  ;;  %745 = vmatmul.f32.gmra.mxu0 %v246_v43 }
 0x17a   :  { %625 = vmatmul.f32.gmra.mxu1 %v247_v46  ;;  %666 = vmatmul.f32.gmra.mxu2 %v247_v46 }
 0x17b   :  { %707 = vmatmul.f32.gmra.mxu3 %v247_v46  ;;  %748 = vmatmul.f32.gmra.mxu0 %v247_v46 }
 0x182   :  { %628 = vmatmul.f32.gmra.mxu1 %v248_v49  ;;  %669 = vmatmul.f32.gmra.mxu2 %v248_v49 }
 0x183   :  { %710 = vmatmul.f32.gmra.mxu3 %v248_v49  ;;  %751 = vmatmul.f32.gmra.mxu0 %v248_v49 }
 0x18a   :  { %631 = vmatmul.f32.gmra.mxu1 %v249_v52  ;;  %672 = vmatmul.f32.gmra.mxu2 %v249_v52 }
 0x18b   :  { %713 = vmatmul.f32.gmra.mxu3 %v249_v52  ;;  %754 = vmatmul.f32.gmra.mxu0 %v249_v52 }
 0x18f   :  { %v341_v56 = vpop.f32.mrf.mxu1 }
 0x190   :  { %v342_v57 = vadd.f32 %v341_v56, %v2516_v54  ;;  %v464_v58 = vpop.f32.mrf.mxu0  ;;  %v584_v56 = vld [vmem:[%s3009_s10] sm:$0xf]  ;;  %s2607_s10 = smov 0  }
 0x191   :  { %v465_v59 = vadd.f32 %v464_v58, %v2518_v55 }
 0x192   :  { %488 = vst [vmem:[#allocation2] sm:$0xff] %v342_v57  ;;  %v2557_v57 = vperm.slane %v584_v56, 0 }
 0x193   :  { %491 = vst [vmem:[#allocation2 + $0x18] sm:$0xff] %v465_v59  ;;  %v2559_v59 = vperm.slane %v584_v56, 3 }
 0x195   :  { %v382_v62 = vpop.f32.mrf.mxu2 }
 0x196   :  { %v383_v63 = vadd.f32 %v382_v62, %v2522_v60  ;;  %v423_v0 = vpop.f32.mrf.mxu3 }
 0x197   :  { %v424_v1 = vadd.f32 %v423_v0, %v2524_v61  ;;  %v344_v2 = vpop.f32.mrf.mxu1 }
 0x198   :  { %489 = vst [vmem:[#allocation2 + $0x8] sm:$0xff] %v383_v63  ;;  %v345_v3 = vadd.f32 %v344_v2, %v2516_v54  ;;  %v467_v4 = vpop.f32.mrf.mxu0 }
 0x199   :  { %490 = vst [vmem:[#allocation2 + $0x10] sm:$0xff] %v424_v1  ;;  %v468_v5 = vadd.f32 %v467_v4, %v2518_v55  ;;  %v2567_v4 = vperm.slane %v584_v56, 2 }
 0x19a   :  { %492 = vst [vmem:[#allocation2 + $0x20] sm:$0xff] %v345_v3  ;;  %v2565_v3 = vperm.slane %v584_v56, 1 }
 0x19b   :  { %495 = vst [vmem:[#allocation2 + $0x38] sm:$0xff] %v468_v5 }
 0x19d   :  { %v385_v6 = vpop.f32.mrf.mxu2 }
 0x19e   :  { %v386_v7 = vadd.f32 %v385_v6, %v2522_v60  ;;  %v426_v8 = vpop.f32.mrf.mxu3 }
 0x19f   :  { %v427_v9 = vadd.f32 %v426_v8, %v2524_v61  ;;  %v347_v10 = vpop.f32.mrf.mxu1 }
 0x1a0   :  { %493 = vst [vmem:[#allocation2 + $0x28] sm:$0xff] %v386_v7  ;;  %v348_v11 = vadd.f32 %v347_v10, %v2516_v54  ;;  %v470_v13 = vpop.f32.mrf.mxu0 }
 0x1a1   :  { %494 = vst [vmem:[#allocation2 + $0x30] sm:$0xff] %v427_v9  ;;  %v471_v14 = vadd.f32 %v470_v13, %v2518_v55 }
 0x1a2   :  { %496 = vst [vmem:[#allocation2 + $0x40] sm:$0xff] %v348_v11 }
 0x1a3   :  { %499 = vst [vmem:[#allocation2 + $0x58] sm:$0xff] %v471_v14 }
 0x1a5   :  { %v388_v15 = vpop.f32.mrf.mxu2 }
 0x1a6   :  { %v389_v16 = vadd.f32 %v388_v15, %v2522_v60  ;;  %v429_v17 = vpop.f32.mrf.mxu3 }
 0x1a7   :  { %v430_v18 = vadd.f32 %v429_v17, %v2524_v61  ;;  %v350_v19 = vpop.f32.mrf.mxu1 }
 0x1a8   :  { %497 = vst [vmem:[#allocation2 + $0x48] sm:$0xff] %v389_v16  ;;  %v351_v20 = vadd.f32 %v350_v19, %v2516_v54  ;;  %v473_v21 = vpop.f32.mrf.mxu0 }
 0x1a9   :  { %498 = vst [vmem:[#allocation2 + $0x50] sm:$0xff] %v430_v18  ;;  %v474_v22 = vadd.f32 %v473_v21, %v2518_v55 }
 0x1aa   :  { %500 = vst [vmem:[#allocation2 + $0x60] sm:$0xff] %v351_v20 }
 0x1ab   :  { %503 = vst [vmem:[#allocation2 + $0x78] sm:$0xff] %v474_v22 }
 0x1ad   :  { %v391_v23 = vpop.f32.mrf.mxu2 }
 0x1ae   :  { %v392_v24 = vadd.f32 %v391_v23, %v2522_v60  ;;  %v432_v25 = vpop.f32.mrf.mxu3 }
 0x1af   :  { %v433_v26 = vadd.f32 %v432_v25, %v2524_v61  ;;  %v353_v12 = vpop.f32.mrf.mxu1 }
 0x1b0   :  { %501 = vst [vmem:[#allocation2 + $0x68] sm:$0xff] %v392_v24  ;;  %v354_v27 = vadd.f32 %v353_v12, %v2516_v54  ;;  %v476_v28 = vpop.f32.mrf.mxu0 }
 0x1b1   :  { %502 = vst [vmem:[#allocation2 + $0x70] sm:$0xff] %v433_v26  ;;  %v477_v29 = vadd.f32 %v476_v28, %v2518_v55 }
 0x1b2   :  { %504 = vst [vmem:[#allocation2 + $0x80] sm:$0xff] %v354_v27 }
 0x1b3   :  { %507 = vst [vmem:[#allocation2 + $0x98] sm:$0xff] %v477_v29 }
 0x1b5   :  { %v394_v30 = vpop.f32.mrf.mxu2 }
 0x1b6   :  { %v395_v31 = vadd.f32 %v394_v30, %v2522_v60  ;;  %v435_v32 = vpop.f32.mrf.mxu3 }
 0x1b7   :  { %v436_v33 = vadd.f32 %v435_v32, %v2524_v61  ;;  %v356_v34 = vpop.f32.mrf.mxu1 }
 0x1b8   :  { %505 = vst [vmem:[#allocation2 + $0x88] sm:$0xff] %v395_v31  ;;  %v357_v35 = vadd.f32 %v356_v34, %v2516_v54  ;;  %v479_v36 = vpop.f32.mrf.mxu0 }
 0x1b9   :  { %506 = vst [vmem:[#allocation2 + $0x90] sm:$0xff] %v436_v33  ;;  %v480_v37 = vadd.f32 %v479_v36, %v2518_v55 }
 0x1ba   :  { %508 = vst [vmem:[#allocation2 + $0xa0] sm:$0xff] %v357_v35 }
 0x1bb   :  { %511 = vst [vmem:[#allocation2 + $0xb8] sm:$0xff] %v480_v37 }
 0x1bd   :  { %v397_v38 = vpop.f32.mrf.mxu2 }
 0x1be   :  { %v398_v39 = vadd.f32 %v397_v38, %v2522_v60  ;;  %v438_v40 = vpop.f32.mrf.mxu3 }
 0x1bf   :  { %v439_v41 = vadd.f32 %v438_v40, %v2524_v61  ;;  %v359_v42 = vpop.f32.mrf.mxu1 }
 0x1c0   :  { %509 = vst [vmem:[#allocation2 + $0xa8] sm:$0xff] %v398_v39  ;;  %v360_v43 = vadd.f32 %v359_v42, %v2516_v54  ;;  %v482_v44 = vpop.f32.mrf.mxu0 }
 0x1c1   :  { %510 = vst [vmem:[#allocation2 + $0xb0] sm:$0xff] %v439_v41  ;;  %v483_v45 = vadd.f32 %v482_v44, %v2518_v55 }
 0x1c2   :  { %512 = vst [vmem:[#allocation2 + $0xc0] sm:$0xff] %v360_v43 }
 0x1c3   :  { %515 = vst [vmem:[#allocation2 + $0xd8] sm:$0xff] %v483_v45 }
 0x1c5   :  { %v400_v46 = vpop.f32.mrf.mxu2 }
 0x1c6   :  { %v401_v47 = vadd.f32 %v400_v46, %v2522_v60  ;;  %v441_v48 = vpop.f32.mrf.mxu3 }
 0x1c7   :  { %v442_v49 = vadd.f32 %v441_v48, %v2524_v61  ;;  %v362_v50 = vpop.f32.mrf.mxu1 }
 0x1c8   :  { %513 = vst [vmem:[#allocation2 + $0xc8] sm:$0xff] %v401_v47  ;;  %v363_v51 = vadd.f32 %v362_v50, %v2516_v54  ;;  %v485_v52 = vpop.f32.mrf.mxu0 }
 0x1c9   :  { %514 = vst [vmem:[#allocation2 + $0xd0] sm:$0xff] %v442_v49  ;;  %v486_v53 = vadd.f32 %v485_v52, %v2518_v55 }
 0x1ca   :  { %516 = vst [vmem:[#allocation2 + $0xe0] sm:$0xff] %v363_v51 }
 0x1cb   :  { %519 = vst [vmem:[#allocation2 + $0xf8] sm:$0xff] %v486_v53 }
 0x1cd   :  { %v403_v58 = vpop.f32.mrf.mxu2 }
 0x1ce   :  { %v404_v62 = vadd.f32 %v403_v58, %v2522_v60  ;;  %v444_v63 = vpop.f32.mrf.mxu3 }
 0x1cf   :  { %v445_v54 = vadd.f32 %v444_v63, %v2524_v61  ;;  %v611_v0 = vpop.f32.mrf.mxu1 }
 0x1d0   :  { %517 = vst [vmem:[#allocation2 + $0xe8] sm:$0xff] %v404_v62  ;;  %v612_v55 = vadd.f32 %v611_v0, %v2557_v57  ;;  %v734_v1 = vpop.f32.mrf.mxu0 }
 0x1d1   :  { %518 = vst [vmem:[#allocation2 + $0xf0] sm:$0xff] %v445_v54  ;;  %v735_v2 = vadd.f32 %v734_v1, %v2559_v59 }
 0x1d2   :  { %758 = vst [vmem:[#allocation3] sm:$0xff] %v612_v55 }
 0x1d3   :  { %761 = vst [vmem:[#allocation3 + $0x18] sm:$0xff] %v735_v2 }
 0x1d5   :  { %v652_v5 = vpop.f32.mrf.mxu2 }
 0x1d6   :  { %v653_v60 = vadd.f32 %v652_v5, %v2565_v3  ;;  %v693_v6 = vpop.f32.mrf.mxu3  ;;  %v2599_v5 = vmov 0.0  }
 0x1d7   :  { %v694_v61 = vadd.f32 %v693_v6, %v2567_v4  ;;  %v614_v7 = vpop.f32.mrf.mxu1  ;;  %v2603_v6 = vmov 0.0  }
 0x1d8   :  { %759 = vst [vmem:[#allocation3 + $0x8] sm:$0xff] %v653_v60  ;;  %v615_v8 = vadd.f32 %v614_v7, %v2557_v57  ;;  %v737_v9 = vpop.f32.mrf.mxu0  ;;  %v2601_v60 = vmov 0.0  }
 0x1d9   :  { %760 = vst [vmem:[#allocation3 + $0x10] sm:$0xff] %v694_v61  ;;  %v738_v10 = vadd.f32 %v737_v9, %v2559_v59 }
 0x1da   :  { %762 = vst [vmem:[#allocation3 + $0x20] sm:$0xff] %v615_v8 }
 0x1db   :  { %765 = vst [vmem:[#allocation3 + $0x38] sm:$0xff] %v738_v10 }
 0x1dd   :  { %v655_v11 = vpop.f32.mrf.mxu2 }
 0x1de   :  { %v656_v13 = vadd.f32 %v655_v11, %v2565_v3  ;;  %v696_v14 = vpop.f32.mrf.mxu3 }
 0x1df   :  { %v697_v15 = vadd.f32 %v696_v14, %v2567_v4  ;;  %v617_v16 = vpop.f32.mrf.mxu1 }
 0x1e0   :  { %763 = vst [vmem:[#allocation3 + $0x28] sm:$0xff] %v656_v13  ;;  %v618_v17 = vadd.f32 %v617_v16, %v2557_v57  ;;  %v740_v18 = vpop.f32.mrf.mxu0 }
 0x1e1   :  { %764 = vst [vmem:[#allocation3 + $0x30] sm:$0xff] %v697_v15  ;;  %v741_v19 = vadd.f32 %v740_v18, %v2559_v59 }
 0x1e2   :  { %766 = vst [vmem:[#allocation3 + $0x40] sm:$0xff] %v618_v17 }
 0x1e3   :  { %769 = vst [vmem:[#allocation3 + $0x58] sm:$0xff] %v741_v19 }
 0x1e5   :  { %v658_v20 = vpop.f32.mrf.mxu2 }
 0x1e6   :  { %v659_v21 = vadd.f32 %v658_v20, %v2565_v3  ;;  %v699_v22 = vpop.f32.mrf.mxu3 }
 0x1e7   :  { %v700_v23 = vadd.f32 %v699_v22, %v2567_v4  ;;  %v620_v24 = vpop.f32.mrf.mxu1 }
 0x1e8   :  { %767 = vst [vmem:[#allocation3 + $0x48] sm:$0xff] %v659_v21  ;;  %v621_v25 = vadd.f32 %v620_v24, %v2557_v57  ;;  %v743_v26 = vpop.f32.mrf.mxu0 }
 0x1e9   :  { %768 = vst [vmem:[#allocation3 + $0x50] sm:$0xff] %v700_v23  ;;  %v744_v12 = vadd.f32 %v743_v26, %v2559_v59 }
 0x1ea   :  { %770 = vst [vmem:[#allocation3 + $0x60] sm:$0xff] %v621_v25 }
 0x1eb   :  { %773 = vst [vmem:[#allocation3 + $0x78] sm:$0xff] %v744_v12 }
 0x1ed   :  { %v661_v27 = vpop.f32.mrf.mxu2 }
 0x1ee   :  { %v662_v28 = vadd.f32 %v661_v27, %v2565_v3  ;;  %v702_v29 = vpop.f32.mrf.mxu3 }
 0x1ef   :  { %v703_v30 = vadd.f32 %v702_v29, %v2567_v4  ;;  %v623_v31 = vpop.f32.mrf.mxu1 }
 0x1f0   :  { %771 = vst [vmem:[#allocation3 + $0x68] sm:$0xff] %v662_v28  ;;  %v624_v32 = vadd.f32 %v623_v31, %v2557_v57  ;;  %v746_v33 = vpop.f32.mrf.mxu0 }
 0x1f1   :  { %772 = vst [vmem:[#allocation3 + $0x70] sm:$0xff] %v703_v30  ;;  %v747_v34 = vadd.f32 %v746_v33, %v2559_v59 }
 0x1f2   :  { %774 = vst [vmem:[#allocation3 + $0x80] sm:$0xff] %v624_v32 }
 0x1f3   :  { %777 = vst [vmem:[#allocation3 + $0x98] sm:$0xff] %v747_v34 }
 0x1f5   :  { %v664_v35 = vpop.f32.mrf.mxu2 }
 0x1f6   :  { %v665_v36 = vadd.f32 %v664_v35, %v2565_v3  ;;  %v705_v37 = vpop.f32.mrf.mxu3 }
 0x1f7   :  { %v706_v38 = vadd.f32 %v705_v37, %v2567_v4  ;;  %v626_v39 = vpop.f32.mrf.mxu1 }
 0x1f8   :  { %775 = vst [vmem:[#allocation3 + $0x88] sm:$0xff] %v665_v36  ;;  %v627_v40 = vadd.f32 %v626_v39, %v2557_v57  ;;  %v749_v41 = vpop.f32.mrf.mxu0 }
 0x1f9   :  { %776 = vst [vmem:[#allocation3 + $0x90] sm:$0xff] %v706_v38  ;;  %v750_v42 = vadd.f32 %v749_v41, %v2559_v59 }
 0x1fa   :  { %778 = vst [vmem:[#allocation3 + $0xa0] sm:$0xff] %v627_v40 }
 0x1fb   :  { %781 = vst [vmem:[#allocation3 + $0xb8] sm:$0xff] %v750_v42 }
 0x1fd   :  { %v667_v43 = vpop.f32.mrf.mxu2 }
 0x1fe   :  { %v668_v44 = vadd.f32 %v667_v43, %v2565_v3  ;;  %v708_v45 = vpop.f32.mrf.mxu3 }
 0x1ff   :  { %v709_v46 = vadd.f32 %v708_v45, %v2567_v4  ;;  %v629_v47 = vpop.f32.mrf.mxu1 }
 0x200   :  { %779 = vst [vmem:[#allocation3 + $0xa8] sm:$0xff] %v668_v44  ;;  %v630_v48 = vadd.f32 %v629_v47, %v2557_v57  ;;  %v752_v49 = vpop.f32.mrf.mxu0 }
 0x201   :  { %780 = vst [vmem:[#allocation3 + $0xb0] sm:$0xff] %v709_v46  ;;  %v753_v50 = vadd.f32 %v752_v49, %v2559_v59 }
 0x202   :  { %782 = vst [vmem:[#allocation3 + $0xc0] sm:$0xff] %v630_v48 }
 0x203   :  { %785 = vst [vmem:[#allocation3 + $0xd8] sm:$0xff] %v753_v50 }
 0x205   :  { %v670_v51 = vpop.f32.mrf.mxu2 }
 0x206   :  { %v671_v52 = vadd.f32 %v670_v51, %v2565_v3  ;;  %v711_v53 = vpop.f32.mrf.mxu3 }
 0x207   :  { %v712_v56 = vadd.f32 %v711_v53, %v2567_v4  ;;  %v632_v58 = vpop.f32.mrf.mxu1 }
 0x208   :  { %783 = vst [vmem:[#allocation3 + $0xc8] sm:$0xff] %v671_v52  ;;  %v633_v62 = vadd.f32 %v632_v58, %v2557_v57  ;;  %v755_v63 = vpop.f32.mrf.mxu0  ;;  %v2605_v57 = vmov 0.0  }
 0x209   :  { %784 = vst [vmem:[#allocation3 + $0xd0] sm:$0xff] %v712_v56  ;;  %v756_v54 = vadd.f32 %v755_v63, %v2559_v59 }
 0x20a   :  { %786 = vst [vmem:[#allocation3 + $0xe0] sm:$0xff] %v633_v62 }
 0x20b   :  { %789 = vst [vmem:[#allocation3 + $0xf8] sm:$0xff] %v756_v54 }
 0x20d   :  { %v673_v0 = vpop.f32.mrf.mxu2 }
 0x20e   :  { %v674_v55 = vadd.f32 %v673_v0, %v2565_v3  ;;  %v714_v1 = vpop.f32.mrf.mxu3 }
 0x20f   :  { %v715_v2 = vadd.f32 %v714_v1, %v2567_v4 }
 0x210   :  { %787 = vst [vmem:[#allocation3 + $0xe8] sm:$0xff] %v674_v55 }
 0x211   :  { %788 = vst [vmem:[#allocation3 + $0xf0] sm:$0xff] %v715_v2 }
 0x212 LB: > { %v872_v59 = vld [vmem:[#allocation10 + $0x1e0] sm:$0xff]  ;;  %v873_v3 = vld [vmem:[#allocation10 + $0x1e8] sm:$0xff]  ;;  %v875_v4 = vld [vmem:[#allocation10 + $0x1f8] sm:$0xff]  ;;  %s1863_s19 = sshll.u32 %s2241_s10, 3  ;;  %s801_s22 = ssub.s32 7, %s2241_s10  ;;  %s2241_s10 = sphi %s2607_s10, %s795_s10   ;;  %v2237_v57 = vphi %v2605_v57, %v1179_v57   ;;  %v2233_v6 = vphi %v2603_v6, %v2664_v6   ;;  %v2229_v60 = vphi %v2601_v60, %v1242_v60   ;;  %v2225_v5 = vphi %v2599_v5, %v1240_v5  }
 0x213   : > { %876 = vmatpush.msra.mxu0 %v872_v59  ;;  %896 = vmatpush.msra.mxu1 %v873_v3  ;;  %v868_v61 = vld [vmem:[#allocation10 + $0x1c0] sm:$0xff]  ;;  %v869_v7 = vld [vmem:[#allocation10 + $0x1c8] sm:$0xff]  ;;  %v871_v8 = vld [vmem:[#allocation10 + $0x1d8] sm:$0xff]  ;;  %s803_s4 = sshra.s32 %s1863_s19, 3  ;;  %s2640_s23 = sshll.u32 %s801_s22, 3 }
 0x214   : > { %936 = vmatpush.msra.mxu3 %v875_v4  ;;  %v864_v9 = vld [vmem:[#allocation10 + $0x1a0] sm:$0xff]  ;;  %v865_v10 = vld [vmem:[#allocation10 + $0x1a8] sm:$0xff]  ;;  %v867_v11 = vld [vmem:[#allocation10 + $0x1b8] sm:$0xff]  ;;  %s1880_s20 = sshll.u32 %s803_s4, 5  ;;  %s960_s6 = sshra.s32 %s2640_s23, 3 }
 0x215   : > { %877 = vmatpush.msra.mxu0 %v868_v61  ;;  %897 = vmatpush.msra.mxu1 %v869_v7  ;;  %v860_v13 = vld [vmem:[#allocation10 + $0x180] sm:$0xff]  ;;  %v861_v14 = vld [vmem:[#allocation10 + $0x188] sm:$0xff]  ;;  %v863_v15 = vld [vmem:[#allocation10 + $0x198] sm:$0xff]  ;;  %s2635_s21 = scalar_lea.vmem [#allocation2], %s1880_s20  ;;  %s1881_s24 = sshll.u32 %s960_s6, 5 }
 0x216   : > { %937 = vmatpush.msra.mxu3 %v871_v8  ;;  %v856_v16 = vld [vmem:[#allocation10 + $0x160] sm:$0xff]  ;;  %v857_v17 = vld [vmem:[#allocation10 + $0x168] sm:$0xff]  ;;  %v859_v18 = vld [vmem:[#allocation10 + $0x178] sm:$0xff]  ;;  %s2645_s25 = scalar_lea.vmem [#allocation3], %s1881_s24  ;;  %s1243_s3 = scalar_lea.vmem [#allocation4], %s1863_s19 }
 0x217   : > { %878 = vmatpush.msra.mxu0 %v864_v9  ;;  %898 = vmatpush.msra.mxu1 %v865_v10  ;;  %v852_v19 = vld [vmem:[#allocation10 + $0x140] sm:$0xff]  ;;  %v853_v20 = vld [vmem:[#allocation10 + $0x148] sm:$0xff]  ;;  %v874_v21 = vld [vmem:[#allocation10 + $0x1f0] sm:$0xff]  ;;  %s1245_s27 = scalar_lea.vmem [#allocation5], %s2640_s23  ;;  %s795_s10 = sadd.s32 1, %s2241_s10  }
 0x218   : > { %938 = vmatpush.msra.mxu3 %v867_v11  ;;  %v855_v22 = vld [vmem:[#allocation10 + $0x158] sm:$0xff]  ;;  %v870_v23 = vld [vmem:[#allocation10 + $0x1d0] sm:$0xff]  ;;  %v848_v24 = vld [vmem:[#allocation10 + $0x120] sm:$0xff]  ;;  %916 = vmatpush.msra.mxu2 %v874_v21  ;;  %p792_p0 = scmp.ge.s32.totalorder %s795_s10, 8  }
 0x219   : > { %879 = vmatpush.msra.mxu0 %v860_v13  ;;  %899 = vmatpush.msra.mxu1 %v861_v14  ;;  %v849_v25 = vld [vmem:[#allocation10 + $0x128] sm:$0xff]  ;;  %v851_v26 = vld [vmem:[#allocation10 + $0x138] sm:$0xff]  ;;  %v866_v12 = vld [vmem:[#allocation10 + $0x1b0] sm:$0xff]  ;;  %s2837_s22 = smov (%p792_p0), 1  }
 0x21a   : > { %939 = vmatpush.msra.mxu3 %v863_v15  ;;  %v844_v27 = vld [vmem:[#allocation10 + $0x100] sm:$0xff]  ;;  %v845_v28 = vld [vmem:[#allocation10 + $0x108] sm:$0xff]  ;;  %917 = vmatpush.msra.mxu2 %v870_v23  ;;  %v847_v29 = vld [vmem:[#allocation10 + $0x118] sm:$0xff] }
 0x21b   : > { %880 = vmatpush.msra.mxu0 %v856_v16  ;;  %900 = vmatpush.msra.mxu1 %v857_v17  ;;  %v862_v30 = vld [vmem:[#allocation10 + $0x190] sm:$0xff]  ;;  %v840_v31 = vld [vmem:[#allocation10 + $0xe0] sm:$0xff]  ;;  %v841_v32 = vld [vmem:[#allocation10 + $0xe8] sm:$0xff] }
 0x21c   : > { %940 = vmatpush.msra.mxu3 %v859_v18  ;;  %918 = vmatpush.msra.mxu2 %v866_v12  ;;  %v843_v33 = vld [vmem:[#allocation10 + $0xf8] sm:$0xff]  ;;  %v858_v34 = vld [vmem:[#allocation10 + $0x170] sm:$0xff]  ;;  %v836_v35 = vld [vmem:[#allocation10 + $0xc0] sm:$0xff] }
 0x21d   : > { %881 = vmatpush.msra.mxu0 %v852_v19  ;;  %901 = vmatpush.msra.mxu1 %v853_v20  ;;  %v837_v36 = vld [vmem:[#allocation10 + $0xc8] sm:$0xff]  ;;  %v839_v37 = vld [vmem:[#allocation10 + $0xd8] sm:$0xff]  ;;  %v854_v38 = vld [vmem:[#allocation10 + $0x150] sm:$0xff] }
 0x21e   : > { %941 = vmatpush.msra.mxu3 %v855_v22  ;;  %919 = vmatpush.msra.mxu2 %v862_v30  ;;  %v832_v39 = vld [vmem:[#allocation10 + $0xa0] sm:$0xff]  ;;  %v833_v40 = vld [vmem:[#allocation10 + $0xa8] sm:$0xff]  ;;  %v835_v41 = vld [vmem:[#allocation10 + $0xb8] sm:$0xff] }
 0x21f   : > { %882 = vmatpush.msra.mxu0 %v848_v24  ;;  %902 = vmatpush.msra.mxu1 %v849_v25  ;;  %v850_v42 = vld [vmem:[#allocation10 + $0x130] sm:$0xff]  ;;  %v828_v43 = vld [vmem:[#allocation10 + $0x80] sm:$0xff]  ;;  %v829_v44 = vld [vmem:[#allocation10 + $0x88] sm:$0xff] }
 0x220   : > { %942 = vmatpush.msra.mxu3 %v851_v26  ;;  %920 = vmatpush.msra.mxu2 %v858_v34  ;;  %v831_v45 = vld [vmem:[#allocation10 + $0x98] sm:$0xff]  ;;  %v846_v46 = vld [vmem:[#allocation10 + $0x110] sm:$0xff]  ;;  %v824_v47 = vld [vmem:[#allocation10 + $0x60] sm:$0xff] }
 0x221   : > { %883 = vmatpush.msra.mxu0 %v844_v27  ;;  %903 = vmatpush.msra.mxu1 %v845_v28  ;;  %v825_v48 = vld [vmem:[#allocation10 + $0x68] sm:$0xff]  ;;  %v827_v49 = vld [vmem:[#allocation10 + $0x78] sm:$0xff]  ;;  %v842_v50 = vld [vmem:[#allocation10 + $0xf0] sm:$0xff] }
 0x222   : > { %943 = vmatpush.msra.mxu3 %v847_v29  ;;  %921 = vmatpush.msra.mxu2 %v854_v38  ;;  %v820_v51 = vld [vmem:[#allocation10 + $0x40] sm:$0xff]  ;;  %v821_v52 = vld [vmem:[#allocation10 + $0x48] sm:$0xff]  ;;  %v823_v53 = vld [vmem:[#allocation10 + $0x58] sm:$0xff] }
 0x223   : > { %884 = vmatpush.msra.mxu0 %v840_v31  ;;  %904 = vmatpush.msra.mxu1 %v841_v32  ;;  %v838_v56 = vld [vmem:[#allocation10 + $0xd0] sm:$0xff]  ;;  %v816_v58 = vld [vmem:[#allocation10 + $0x20] sm:$0xff]  ;;  %v817_v62 = vld [vmem:[#allocation10 + $0x28] sm:$0xff] }
 0x224   : > { %944 = vmatpush.msra.mxu3 %v843_v33  ;;  %922 = vmatpush.msra.mxu2 %v850_v42  ;;  %v819_v63 = vld [vmem:[#allocation10 + $0x38] sm:$0xff]  ;;  %v834_v54 = vld [vmem:[#allocation10 + $0xb0] sm:$0xff]  ;;  %v812_v0 = vld [vmem:[#allocation10] sm:$0xff] }
 0x225   : > { %885 = vmatpush.msra.mxu0 %v836_v35  ;;  %905 = vmatpush.msra.mxu1 %v837_v36  ;;  %v813_v55 = vld [vmem:[#allocation10 + $0x8] sm:$0xff]  ;;  %v815_v1 = vld [vmem:[#allocation10 + $0x18] sm:$0xff]  ;;  %v1029_v2 = vld [vmem:[#allocation13 + $0x1e0] sm:$0xff] }
 0x226   : > { %945 = vmatpush.msra.mxu3 %v839_v37  ;;  %923 = vmatpush.msra.mxu2 %v846_v46  ;;  %v1030_v59 = vld [vmem:[#allocation13 + $0x1e8] sm:$0xff]  ;;  %v1032_v3 = vld [vmem:[#allocation13 + $0x1f8] sm:$0xff]  ;;  %v1025_v4 = vld [vmem:[#allocation13 + $0x1c0] sm:$0xff] }
 0x227   : > { %886 = vmatpush.msra.mxu0 %v832_v39  ;;  %906 = vmatpush.msra.mxu1 %v833_v40  ;;  %v830_v61 = vld [vmem:[#allocation10 + $0x90] sm:$0xff]  ;;  %v1026_v7 = vld [vmem:[#allocation13 + $0x1c8] sm:$0xff]  ;;  %v1028_v8 = vld [vmem:[#allocation13 + $0x1d8] sm:$0xff] }
 0x228   : > { %946 = vmatpush.msra.mxu3 %v835_v41  ;;  %924 = vmatpush.msra.mxu2 %v842_v50  ;;  %v1021_v9 = vld [vmem:[#allocation13 + $0x1a0] sm:$0xff]  ;;  %v826_v10 = vld [vmem:[#allocation10 + $0x70] sm:$0xff]  ;;  %v1022_v11 = vld [vmem:[#allocation13 + $0x1a8] sm:$0xff] }
 0x229   : > { %887 = vmatpush.msra.mxu0 %v828_v43  ;;  %907 = vmatpush.msra.mxu1 %v829_v44  ;;  %v1024_v13 = vld [vmem:[#allocation13 + $0x1b8] sm:$0xff]  ;;  %v1017_v14 = vld [vmem:[#allocation13 + $0x180] sm:$0xff]  ;;  %v1018_v15 = vld [vmem:[#allocation13 + $0x188] sm:$0xff] }
 0x22a   : > { %947 = vmatpush.msra.mxu3 %v831_v45  ;;  %925 = vmatpush.msra.mxu2 %v838_v56  ;;  %v1020_v16 = vld [vmem:[#allocation13 + $0x198] sm:$0xff]  ;;  %v1013_v17 = vld [vmem:[#allocation13 + $0x160] sm:$0xff]  ;;  %v822_v18 = vld [vmem:[#allocation10 + $0x50] sm:$0xff] }
 0x22b   : > { %888 = vmatpush.msra.mxu0 %v824_v47  ;;  %908 = vmatpush.msra.mxu1 %v825_v48  ;;  %v1014_v19 = vld [vmem:[#allocation13 + $0x168] sm:$0xff]  ;;  %v1016_v20 = vld [vmem:[#allocation13 + $0x178] sm:$0xff]  ;;  %v818_v21 = vld [vmem:[#allocation10 + $0x30] sm:$0xff] }
 0x22c   : > { %948 = vmatpush.msra.mxu3 %v827_v49  ;;  %926 = vmatpush.msra.mxu2 %v834_v54  ;;  %v1009_v22 = vld [vmem:[#allocation13 + $0x140] sm:$0xff]  ;;  %v1010_v23 = vld [vmem:[#allocation13 + $0x148] sm:$0xff]  ;;  %v1012_v24 = vld [vmem:[#allocation13 + $0x158] sm:$0xff] }
 0x22d   : > { %889 = vmatpush.msra.mxu0 %v820_v51  ;;  %909 = vmatpush.msra.mxu1 %v821_v52  ;;  %v814_v25 = vld [vmem:[#allocation10 + $0x10] sm:$0xff]  ;;  %v1005_v26 = vld [vmem:[#allocation13 + $0x120] sm:$0xff]  ;;  %v1006_v12 = vld [vmem:[#allocation13 + $0x128] sm:$0xff] }
 0x22e   : > { %949 = vmatpush.msra.mxu3 %v823_v53  ;;  %927 = vmatpush.msra.mxu2 %v830_v61  ;;  %v1008_v27 = vld [vmem:[#allocation13 + $0x138] sm:$0xff]  ;;  %v1031_v28 = vld [vmem:[#allocation13 + $0x1f0] sm:$0xff]  ;;  %v1001_v29 = vld [vmem:[#allocation13 + $0x100] sm:$0xff] }
 0x22f   : > { %890 = vmatpush.msra.mxu0 %v816_v58  ;;  %910 = vmatpush.msra.mxu1 %v817_v62  ;;  %v1002_v30 = vld [vmem:[#allocation13 + $0x108] sm:$0xff]  ;;  %v1004_v31 = vld [vmem:[#allocation13 + $0x118] sm:$0xff]  ;;  %v1027_v32 = vld [vmem:[#allocation13 + $0x1d0] sm:$0xff] }
 0x230   : > { %950 = vmatpush.msra.mxu3 %v819_v63  ;;  %928 = vmatpush.msra.mxu2 %v826_v10  ;;  %v997_v33 = vld [vmem:[#allocation13 + $0xe0] sm:$0xff]  ;;  %v998_v34 = vld [vmem:[#allocation13 + $0xe8] sm:$0xff]  ;;  %v1000_v35 = vld [vmem:[#allocation13 + $0xf8] sm:$0xff] }
 0x231   : > { %891 = vmatpush.msra.mxu0 %v812_v0  ;;  %911 = vmatpush.msra.mxu1 %v813_v55  ;;  %v993_v36 = vld [vmem:[#allocation13 + $0xc0] sm:$0xff]  ;;  %v1023_v37 = vld [vmem:[#allocation13 + $0x1b0] sm:$0xff]  ;;  %v994_v38 = vld [vmem:[#allocation13 + $0xc8] sm:$0xff] }
 0x232   : > { %951 = vmatpush.msra.mxu3 %v815_v1  ;;  %912 = vmatmul.f32.vlgmr.msra.gmra.mxu1 %v2237_v57  ;;  %v996_v39 = vld [vmem:[#allocation13 + $0xd8] sm:$0xff]  ;;  %v989_v40 = vld [vmem:[#allocation13 + $0xa0] sm:$0xff]  ;;  %v1019_v41 = vld [vmem:[#allocation13 + $0x190] sm:$0xff] }
 0x233   : > { %1033 = vmatpush.msrb.mxu0 %v1029_v2  ;;  %1053 = vmatpush.msrb.mxu1 %v1030_v59  ;;  %v990_v42 = vld [vmem:[#allocation13 + $0xa8] sm:$0xff]  ;;  %v992_v43 = vld [vmem:[#allocation13 + $0xb8] sm:$0xff]  ;;  %v985_v44 = vld [vmem:[#allocation13 + $0x80] sm:$0xff] }
 0x234   : > { %1093 = vmatpush.msrb.mxu3 %v1032_v3  ;;  %929 = vmatpush.msra.mxu2 %v822_v18  ;;  %v1015_v45 = vld [vmem:[#allocation13 + $0x170] sm:$0xff]  ;;  %v986_v46 = vld [vmem:[#allocation13 + $0x88] sm:$0xff]  ;;  %v988_v47 = vld [vmem:[#allocation13 + $0x98] sm:$0xff] }
 0x235   : > { %1034 = vmatpush.msrb.mxu0 %v1025_v4  ;;  %1054 = vmatpush.msrb.mxu1 %v1026_v7  ;;  %v981_v48 = vld [vmem:[#allocation13 + $0x60] sm:$0xff]  ;;  %v982_v49 = vld [vmem:[#allocation13 + $0x68] sm:$0xff]  ;;  %v984_v50 = vld [vmem:[#allocation13 + $0x78] sm:$0xff] }
 0x236   : > { %1094 = vmatpush.msrb.mxu3 %v1028_v8  ;;  %892 = vmatmul.f32.vlgmr.msra.gmra.mxu0 %v2237_v57  ;;  %v1011_v51 = vld [vmem:[#allocation13 + $0x150] sm:$0xff]  ;;  %v977_v52 = vld [vmem:[#allocation13 + $0x40] sm:$0xff]  ;;  %v978_v53 = vld [vmem:[#allocation13 + $0x48] sm:$0xff] }
 0x237   : > { %1035 = vmatpush.msrb.mxu0 %v1021_v9  ;;  %1055 = vmatpush.msrb.mxu1 %v1022_v11  ;;  %v980_v56 = vld [vmem:[#allocation13 + $0x58] sm:$0xff]  ;;  %v1007_v58 = vld [vmem:[#allocation13 + $0x130] sm:$0xff]  ;;  %v973_v62 = vld [vmem:[#allocation13 + $0x20] sm:$0xff] }
 0x238   : > { %1095 = vmatpush.msrb.mxu3 %v1024_v13  ;;  %930 = vmatpush.msra.mxu2 %v818_v21  ;;  %v974_v63 = vld [vmem:[#allocation13 + $0x28] sm:$0xff]  ;;  %v976_v54 = vld [vmem:[#allocation13 + $0x38] sm:$0xff]  ;;  %v1003_v0 = vld [vmem:[#allocation13 + $0x110] sm:$0xff] }
 0x239   : > { %1036 = vmatpush.msrb.mxu0 %v1017_v14  ;;  %1056 = vmatpush.msrb.mxu1 %v1018_v15  ;;  %v969_v55 = vld [vmem:[#allocation13] sm:$0xff]  ;;  %v970_v1 = vld [vmem:[#allocation13 + $0x8] sm:$0xff]  ;;  %v972_v2 = vld [vmem:[#allocation13 + $0x18] sm:$0xff] }
 0x23a   : > { %1096 = vmatpush.msrb.mxu3 %v1020_v16  ;;  %931 = vmatpush.msra.mxu2 %v814_v25  ;;  %v995_v59 = vld [vmem:[#allocation13 + $0xd0] sm:$0xff]  ;;  %v808_v14 = vld [vmem:[%s2635_s21] sm:$0xff]  ;;  %v811_v21 = vld [vmem:[%s2635_s21 + $0x18] sm:$0xff] }
 0x23b   : > { %1037 = vmatpush.msrb.mxu0 %v1013_v17  ;;  %1057 = vmatpush.msrb.mxu1 %v1014_v19  ;;  %v991_v3 = vld [vmem:[#allocation13 + $0xb0] sm:$0xff] }
 0x23c   : > { %1097 = vmatpush.msrb.mxu3 %v1016_v20  ;;  %1073 = vmatpush.msrb.mxu2 %v1031_v28  ;;  %v987_v4 = vld [vmem:[#allocation13 + $0x90] sm:$0xff] }
 0x23d   : > { %1038 = vmatpush.msrb.mxu0 %v1009_v22  ;;  %1058 = vmatpush.msrb.mxu1 %v1010_v23  ;;  %v983_v61 = vld [vmem:[#allocation13 + $0x70] sm:$0xff] }
 0x23e   : > { %1098 = vmatpush.msrb.mxu3 %v1012_v24  ;;  %1074 = vmatpush.msrb.mxu2 %v1027_v32  ;;  %v979_v7 = vld [vmem:[#allocation13 + $0x50] sm:$0xff] }
 0x23f   : > { %1039 = vmatpush.msrb.mxu0 %v1005_v26  ;;  %1059 = vmatpush.msrb.mxu1 %v1006_v12  ;;  %v975_v8 = vld [vmem:[#allocation13 + $0x30] sm:$0xff] }
 0x240   : > { %1099 = vmatpush.msrb.mxu3 %v1008_v27  ;;  %1075 = vmatpush.msrb.mxu2 %v1023_v37  ;;  %v971_v9 = vld [vmem:[#allocation13 + $0x10] sm:$0xff] }
 0x241   : > { %1040 = vmatpush.msrb.mxu0 %v1001_v29  ;;  %1060 = vmatpush.msrb.mxu1 %v1002_v30  ;;  %v809_v10 = vld [vmem:[%s2635_s21 + $0x8] sm:$0xff]  ;;  %v810_v30 = vld [vmem:[%s2635_s21 + $0x10] sm:$0xff] }
 0x242   : > { %1100 = vmatpush.msrb.mxu3 %v1004_v31  ;;  %1076 = vmatpush.msrb.mxu2 %v1019_v41 }
 0x243   : > { %952 = vmatmul.f32.vlgmr.msra.gmra.mxu3 %v2237_v57  ;;  %1041 = vmatpush.msrb.mxu0 %v997_v33 }
 0x244   : > { %1061 = vmatpush.msrb.mxu1 %v998_v34  ;;  %1101 = vmatpush.msrb.mxu3 %v1000_v35  ;;  %v965_v35 = vld [vmem:[%s2645_s25] sm:$0xff] }
 0x245   : > { %1042 = vmatpush.msrb.mxu0 %v993_v36  ;;  %1077 = vmatpush.msrb.mxu2 %v1015_v45  ;;  %v966_v36 = vld [vmem:[%s2645_s25 + $0x8] sm:$0xff] }
 0x246   : > { %1062 = vmatpush.msrb.mxu1 %v994_v38  ;;  %1102 = vmatpush.msrb.mxu3 %v996_v39 }
 0x247   : > { %1043 = vmatpush.msrb.mxu0 %v989_v40  ;;  %932 = vmatmul.f32.vlgmr.msra.gmra.mxu2 %v2237_v57  ;;  %v999_v57 = vld [vmem:[#allocation13 + $0xf0] sm:$0xff] }
 0x248   : > { %1063 = vmatpush.msrb.mxu1 %v990_v42  ;;  %1103 = vmatpush.msrb.mxu3 %v992_v43 }
 0x249   : > { %1044 = vmatpush.msrb.mxu0 %v985_v44  ;;  %1078 = vmatpush.msrb.mxu2 %v1011_v51 }
 0x24a   : > { %1064 = vmatpush.msrb.mxu1 %v986_v46  ;;  %1104 = vmatpush.msrb.mxu3 %v988_v47 }
 0x24b   : > { %1045 = vmatpush.msrb.mxu0 %v981_v48  ;;  %1079 = vmatpush.msrb.mxu2 %v1007_v58 }
 0x24c   : > { %1065 = vmatpush.msrb.mxu1 %v982_v49  ;;  %1105 = vmatpush.msrb.mxu3 %v984_v50 }
 0x24d   : > { %1046 = vmatpush.msrb.mxu0 %v977_v52  ;;  %1080 = vmatpush.msrb.mxu2 %v1003_v0 }
 0x24e   : > { %1066 = vmatpush.msrb.mxu1 %v978_v53  ;;  %1106 = vmatpush.msrb.mxu3 %v980_v56 }
 0x24f   : > { %1047 = vmatpush.msrb.mxu0 %v973_v62  ;;  %1081 = vmatpush.msrb.mxu2 %v999_v57 }
 0x250   : > { %1067 = vmatpush.msrb.mxu1 %v974_v63  ;;  %1107 = vmatpush.msrb.mxu3 %v976_v54  ;;  %v968_v54 = vld [vmem:[%s2645_s25 + $0x18] sm:$0xff] }
 0x251   : > { %1048 = vmatpush.msrb.mxu0 %v969_v55  ;;  %1082 = vmatpush.msrb.mxu2 %v995_v59 }
 0x252   : > { %1068 = vmatpush.msrb.mxu1 %v970_v1  ;;  %1108 = vmatpush.msrb.mxu3 %v972_v2 }
 0x253   : > { %1049 = vmatmul.f32.vlgmr.msrb.gmra.mxu0 %v2229_v60  ;;  %1069 = vmatmul.f32.vlgmr.msrb.gmra.mxu1 %v2229_v60 }
 0x254   : > { %1109 = vmatmul.f32.vlgmr.msrb.gmra.mxu3 %v2229_v60  ;;  %1083 = vmatpush.msrb.mxu2 %v991_v3 }
 0x256   : > { %1084 = vmatpush.msrb.mxu2 %v987_v4 }
 0x258   : > { %1085 = vmatpush.msrb.mxu2 %v983_v61 }
 0x25a   : > { %1086 = vmatpush.msrb.mxu2 %v979_v7 }
 0x25c   : > { %1087 = vmatpush.msrb.mxu2 %v975_v8 }
 0x25e   : > { %1088 = vmatpush.msrb.mxu2 %v971_v9 }
 0x25f   : > { %1089 = vmatmul.f32.vlgmr.msrb.gmra.mxu2 %v2229_v60 }
 0x2af   : > { %v913_v11 = vpop.f32.mrf.mxu1 }
 0x2b0   : > { %v957_v13 = vadd.f32 %v913_v11, %v809_v10 }
 0x2b2   : > { %v1870_v15 = vmul.f32 -1.442695, %v957_v13 }
 0x2b3   : > { %v893_v16 = vpop.f32.mrf.mxu0 }
 0x2b4   : > { %v956_v17 = vadd.f32 %v893_v16, %v808_v14  ;;  %2010 = vpow2.f32 %v1870_v15 }
 0x2b6   : > { %v1869_v18 = vmul.f32 -1.442695, %v956_v17 }
 0x2b8   : > { %2012 = vpow2.f32 %v1869_v18 }
 0x2ba   : > { %v2011_v60 = vpop.eup %2010 }
 0x2bb   : > { %v1139_v19 = vadd.f32 1.0, %v2011_v60 }
 0x2bd   : > { %2014 = vrcp.f32 %v1139_v19  ;;  %v1151_v27 = vand.u32 2147483648, %v1139_v19  ;;  %v1149_v28 = vand.u32 2147483647, %v1139_v19  ;;  %vm1145_vm2 = vweird.f32 %v1139_v19 }
 0x2be   : > { %v2013_v20 = vpop.eup %2012 }
 0x2bf   : > { %v1120_v22 = vadd.f32 1.0, %v2013_v20  ;;  %v1152_v38 = vor.u32 1.1754944e-38, %v1151_v27  ;;  %vm2653_vm6 = vcmp.eq.f32.partialorder %v1149_v28, 8.507059e+37 }
 0x2c1   : > { %2016 = vrcp.f32 %v1120_v22  ;;  %vm1126_vm5 = vweird.f32 %v1120_v22  ;;  %v1130_v42 = vand.u32 2147483647, %v1120_v22  ;;  %v1132_v43 = vand.u32 2147483648, %v1120_v22 }
 0x2c3   : > { %v2015_v25 = vpop.eup %2014  ;;  %v1133_v58 = vor.u32 1.1754944e-38, %v1132_v43  ;;  %vm1131_vm9 = vcmp.eq.f32.partialorder %v1130_v42, 8.507059e+37 }
 0x2c4   : > { %v1141_v12 = vmul.f32 %v2015_v25, %v1139_v19  ;;  %vm1146_vm3 = vweird.f32 %v2015_v25 }
 0x2c5   : > { %vm2649_vm4 = vmor %vm1145_vm2, %vm1146_vm3 }
 0x2c6   : > { %v953_v23 = vpop.f32.mrf.mxu3  ;;  %v1142_v29 = vsub.f32 1.0, %v1141_v12 }
 0x2c7   : > { %v959_v24 = vadd.f32 %v953_v23, %v811_v21  ;;  %v2017_v31 = vpop.eup %2016 }
 0x2c8   : > { %v1122_v32 = vmul.f32 %v2017_v31, %v1120_v22  ;;  %v1143_v33 = vmul.f32 %v2015_v25, %v1142_v29  ;;  %vm1127_vm7 = vweird.f32 %v2017_v31 }
 0x2c9   : > { %v1871_v26 = vmul.f32 -1.442695, %v959_v24  ;;  %vm1128_vm8 = vmor %vm1126_vm5, %vm1127_vm7  ;;  %v967_v24 = vld [vmem:[%s2645_s25 + $0x10] sm:$0xff] }
 0x2ca   : > { %v933_v34 = vpop.f32.mrf.mxu2  ;;  %v1123_v41 = vsub.f32 1.0, %v1122_v32  ;;  %v1144_v44 = vadd.f32 %v2015_v25, %v1143_v33 }
 0x2cb   : > { %2018 = vpow2.f32 %v1871_v26  ;;  %v958_v39 = vadd.f32 %v933_v34, %v810_v30 }
 0x2cc   : > { %v1124_v51 = vmul.f32 %v2017_v31, %v1123_v41  ;;  %v1148_v52 = vsel %vm2649_vm4, %v2015_v25, %v1144_v44 }
 0x2cd   : > { %2020 = vtanh.f32 %v958_v39  ;;  %v1153_v62 = vsel %vm2653_vm6, %v1152_v38, %v1148_v52 }
 0x2ce   : > { %v1125_v63 = vadd.f32 %v2017_v31, %v1124_v51  ;;  %v1175_v1 = vmul.f32 %v2233_v6, %v1153_v62 }
 0x2d0   : > { %v1050_v45 = vpop.f32.mrf.mxu0  ;;  %v1070_v46 = vpop.f32.mrf.mxu1  ;;  %v1129_v55 = vsel %vm1128_vm8, %v2017_v31, %v1125_v63 }
 0x2d1   : > { %v2019_v47 = vpop.eup %2018  ;;  %v1113_v48 = vadd.f32 %v1050_v45, %v965_v35  ;;  %v1114_v49 = vadd.f32 %v1070_v46, %v966_v36  ;;  %v1134_v57 = vsel %vm1131_vm9, %v1133_v58, %v1129_v55  ;;  %v1277_v55 = vld [vmem:[%s3010_s11 + $0x70] sm:$0xff] (%p792_p0) }
 0x2d2   : > { %v1159_v50 = vadd.f32 1.0, %v2019_v47 }
 0x2d3   : > { %v1872_v53 = vmul.f32 -1.442695, %v1113_v48  ;;  %v1873_v56 = vmul.f32 -1.442695, %v1114_v49  ;;  %v2021_v0 = vpop.eup %2020 }
 0x2d4   : > { %2022 = vrcp.f32 %v1159_v50  ;;  %v1176_v3 = vmul.f32 %v2021_v0, %v1134_v57  ;;  %vm1165_vm10 = vweird.f32 %v1159_v50  ;;  %v1169_v10 = vand.u32 2147483647, %v1159_v50  ;;  %v1278_v0 = vld [vmem:[%s3010_s11 + $0x78] sm:$0xff] (%p792_p0) }
 0x2d5   : > { %2024 = vpow2.f32 %v1872_v53  ;;  %v1171_v11 = vand.u32 2147483648, %v1159_v50  ;;  %1886 = vmatpush.msra.mxu2 (%p792_p0), %v1278_v0  ;;  %1299 = vmatpush.msra.mxu0 (%p792_p0), %v1278_v0  ;;  %v2043_v0 = vld [vmem:[%s3012_s13] ss:$0 sm:$0xff] (%p792_p0) }
 0x2d6   : > { %2026 = vpow2.f32 %v1873_v56  ;;  %v2664_v6 = vadd.f32 %v1176_v3, %v1175_v1   ;;  %vm1170_vm13 = vcmp.eq.f32.partialorder %v1169_v10, 8.507059e+37  ;;  %v1294_v1 = vld [vmem:[%s3010_s11 + $0xf8] sm:$0xff] (%p792_p0)  ;;  %v1271_v10 = vld [vmem:[%s3010_s11 + $0x40] sm:$0xff] (%p792_p0) }
 0x2d7   : > { %v1110_v2 = vpop.f32.mrf.mxu3  ;;  %v1172_v17 = vor.u32 1.1754944e-38, %v1171_v11  ;;  %1902 = vmatpush.msra.mxu3 (%p792_p0), %v1294_v1  ;;  %1340 = vmatpush.msra.mxu1 (%p792_p0), %v1294_v1  ;;  %v1274_v3 = vld [vmem:[%s3010_s11 + $0x58] sm:$0xff] (%p792_p0)  ;;  %v1287_v11 = vld [vmem:[%s3010_s11 + $0xc0] sm:$0xff] (%p792_p0) }
 0x2d8   : > { %v1116_v59 = vadd.f32 %v1110_v2, %v968_v54  ;;  %v1293_v2 = vld [vmem:[%s3010_s11 + $0xf0] sm:$0xff] (%p792_p0)  ;;  %1887 = vmatpush.msra.mxu2 (%p792_p0), %v1277_v55  ;;  %1300 = vmatpush.msra.mxu0 (%p792_p0), %v1277_v55 }
 0x2d9   :  { %1903 = vmatpush.msra.mxu3 (%p792_p0), %v1293_v2  ;;  %1341 = vmatpush.msra.mxu1 (%p792_p0), %v1293_v2 }
 0x2da   : > { %v2023_v4 = vpop.eup %2022  ;;  %v1874_v61 = vmul.f32 -1.442695, %v1116_v59  ;;  %v1291_v59 = vld [vmem:[%s3010_s11 + $0xe0] sm:$0xff] (%p792_p0) }
 0x2db   : > { %v2025_v7 = vpop.eup %2024  ;;  %v1161_v8 = vmul.f32 %v2023_v4, %v1159_v50  ;;  %vm1166_vm11 = vweird.f32 %v2023_v4 }
 0x2dc   : > { %v2027_v9 = vpop.eup %2026  ;;  %v1183_v13 = vadd.f32 1.0, %v2025_v7  ;;  %2028 = vpow2.f32 %v1874_v61  ;;  %vm1167_vm12 = vmor %vm1165_vm10, %vm1166_vm11  ;;  %v1273_v61 = vld [vmem:[%s3010_s11 + $0x50] sm:$0xff] (%p792_p0)  ;;  %vm1381_vm10 = vcmask (%p792_p0), 39936  }
 0x2dd   : > { %v1162_v14 = vsub.f32 1.0, %v1161_v8  ;;  %2030 = vtanh.f32 %v2664_v6  ;;  %v1202_v15 = vadd.f32 1.0, %v2027_v9  ;;  %v1292_v6 = vld [vmem:[%s3010_s11 + $0xe8] sm:$0xff] (%p792_p0)  ;;  %v1289_v7 = vld [vmem:[%s3010_s11 + $0xd0] sm:$0xff] (%p792_p0) }
 0x2de   : > { %2032 = vrcp.f32 %v1183_v13  ;;  %v1193_v31 = vand.u32 2147483647, %v1183_v13  ;;  %v1195_v32 = vand.u32 2147483648, %v1183_v13  ;;  %vm1189_vm0 = vweird.f32 %v1183_v13  ;;  %1904 = vmatpush.msra.mxu3 (%p792_p0), %v1292_v6  ;;  %1342 = vmatpush.msra.mxu1 (%p792_p0), %v1292_v6  ;;  %v1272_v8 = vld [vmem:[%s3010_s11 + $0x48] sm:$0xff] (%p792_p0) }
 0x2df   : > { %v1163_v16 = vmul.f32 %v2023_v4, %v1162_v14  ;;  %2034 = vrcp.f32 %v1202_v15  ;;  %v1214_v33 = vand.u32 2147483648, %v1202_v15  ;;  %v1212_v36 = vand.u32 2147483647, %v1202_v15  ;;  %v1288_v9 = vld [vmem:[%s3010_s11 + $0xc8] sm:$0xff] (%p792_p0)  ;;  %v1286_v14 = vld [vmem:[%s3010_s11 + $0xb8] sm:$0xff] (%p792_p0) }
 0x2e0   : > { %vm1208_vm1 = vweird.f32 %v1202_v15  ;;  %v1196_v40 = vor.u32 1.1754944e-38, %v1195_v32  ;;  %vm1194_vm4 = vcmp.eq.f32.partialorder %v1193_v31, 8.507059e+37  ;;  %1905 = vmatpush.msra.mxu3 (%p792_p0), %v1291_v59  ;;  %1343 = vmatpush.msra.mxu1 (%p792_p0), %v1291_v59 }
 0x2e1   : > { %v1164_v18 = vadd.f32 %v2023_v4, %v1163_v16  ;;  %v1215_v42 = vor.u32 1.1754944e-38, %v1214_v33  ;;  %vm1213_vm5 = vcmp.eq.f32.partialorder %v1212_v36, 8.507059e+37  ;;  %v1285_v16 = vld [vmem:[%s3010_s11 + $0xb0] sm:$0xff] (%p792_p0) }
 0x2e2   : > { %v2029_v60 = vpop.eup %2028  ;;  %v1090_v27 = vpop.f32.mrf.mxu2 }
 0x2e3   : > { %v2031_v19 = vpop.eup %2030  ;;  %v1168_v20 = vsel %vm1167_vm12, %v2023_v4, %v1164_v18  ;;  %v1222_v21 = vadd.f32 1.0, %v2029_v60  ;;  %v1115_v29 = vadd.f32 %v1090_v27, %v967_v24  ;;  %v1290_v4 = vld [vmem:[%s3010_s11 + $0xd8] sm:$0xff] (%p792_p0)  ;;  %v1284_v18 = vld [vmem:[%s3010_s11 + $0xa8] sm:$0xff] (%p792_p0) }
 0x2e4   : > { %v2033_v22 = vpop.eup %2032  ;;  %v1173_v23 = vsel %vm1170_vm13, %v1172_v17, %v1168_v20  ;;  %1906 = vmatpush.msra.mxu3 (%p792_p0), %v1290_v4  ;;  %1344 = vmatpush.msra.mxu1 (%p792_p0), %v1290_v4  ;;  %v1268_v17 = vld [vmem:[%s3010_s11 + $0x28] sm:$0xff] (%p792_p0)  ;;  %v1266_v20 = vld [vmem:[%s3010_s11 + $0x18] sm:$0xff] (%p792_p0) }
 0x2e5   : > { %v2035_v25 = vpop.eup %2034  ;;  %v1179_v57 = vmul.f32 %v2031_v19, %v1173_v23   ;;  %v1185_v26 = vmul.f32 %v2033_v22, %v1183_v13  ;;  %2036 = vrcp.f32 %v1222_v21  ;;  %vm1190_vm14 = vweird.f32 %v2033_v22  ;;  %v1270_v13 = vld [vmem:[%s3010_s11 + $0x38] sm:$0xff] (%p792_p0)  ;;  %v1283_v19 = vld [vmem:[%s3010_s11 + $0xa0] sm:$0xff] (%p792_p0)  ;;  %v1281_v23 = vld [vmem:[%s3010_s11 + $0x90] sm:$0xff] (%p792_p0) }
 0x2e6   : > { %v1204_v12 = vmul.f32 %v2035_v25, %v1202_v15  ;;  %2038 = vtanh.f32 %v1115_v29  ;;  %vm1209_vm15 = vweird.f32 %v2035_v25  ;;  %vm1191_vm2 = vmor %vm1189_vm0, %vm1190_vm14  ;;  %v1234_v53 = vand.u32 2147483648, %v1222_v21  ;;  %1907 = vmatpush.msra.mxu3 (%p792_p0), %v1289_v7  ;;  %1345 = vmatpush.msra.mxu1 (%p792_p0), %v1289_v7  ;;  %v1269_v15 = vld [vmem:[%s3010_s11 + $0x30] sm:$0xff] (%p792_p0)  ;;  %v1264_v24 = vld [vmem:[%s3010_s11 + $0x8] sm:$0xff] (%p792_p0) }
 0x2e7   : > { %1244 = vst [vmem:[%s1243_s3] sm:$0xff] %v1179_v57  ;;  %v1186_v28 = vsub.f32 1.0, %v1185_v26  ;;  %vm1210_vm3 = vmor %vm1208_vm1, %vm1209_vm15  ;;  %vm1228_vm7 = vweird.f32 %v1222_v21  ;;  %v1232_v56 = vand.u32 2147483647, %v1222_v21  ;;  %v1275_v57 = vld [vmem:[%s3010_s11 + $0x60] sm:$0xff] (%p792_p0) }
 0x2e8   : > { %v1205_v30 = vsub.f32 1.0, %v1204_v12  ;;  %v1235_v62 = vor.u32 1.1754944e-38, %v1234_v53  ;;  %1908 = vmatpush.msra.mxu3 (%p792_p0), %v1288_v9  ;;  %1346 = vmatpush.msra.mxu1 (%p792_p0), %v1288_v9  ;;  %v1263_v26 = vld [vmem:[%s3010_s11] sm:$0xff] (%p792_p0) }
 0x2e9   : > { %v1187_v34 = vmul.f32 %v2033_v22, %v1186_v28  ;;  %vm1233_vm9 = vcmp.eq.f32.partialorder %v1232_v56, 8.507059e+37  ;;  %v1279_v12 = vld [vmem:[%s3010_s11 + $0x80] sm:$0xff] (%p792_p0) }
 0x2ea   : > { %v1206_v35 = vmul.f32 %v2035_v25, %v1205_v30  ;;  %1909 = vmatpush.msra.mxu3 (%p792_p0), %v1287_v11  ;;  %1347 = vmatpush.msra.mxu1 (%p792_p0), %v1287_v11 }
 0x2eb   : > { %v2037_v37 = vpop.eup %2036  ;;  %v1188_v38 = vadd.f32 %v2033_v22, %v1187_v34 }
 0x2ec   : > { %v1224_v39 = vmul.f32 %v2037_v37, %v1222_v21  ;;  %v1207_v41 = vadd.f32 %v2035_v25, %v1206_v35  ;;  %v2039_v47 = vpop.eup %2038  ;;  %vm1229_vm6 = vweird.f32 %v2037_v37  ;;  %1910 = vmatpush.msra.mxu3 (%p792_p0), %v1286_v14  ;;  %1348 = vmatpush.msra.mxu1 (%p792_p0), %v1286_v14  ;;  %v1282_v21 = vld [vmem:[%s3010_s11 + $0x98] sm:$0xff] (%p792_p0) }
 0x2ed   : > { %v1192_v43 = vsel %vm1191_vm2, %v2033_v22, %v1188_v38  ;;  %vm1230_vm8 = vmor %vm1228_vm7, %vm1229_vm6  ;;  %v1265_v22 = vld [vmem:[%s3010_s11 + $0x10] sm:$0xff] (%p792_p0) }
 0x2ee   : > { %v1225_v44 = vsub.f32 1.0, %v1224_v39  ;;  %v1197_v45 = vsel %vm1194_vm4, %v1196_v40, %v1192_v43  ;;  %v1211_v46 = vsel %vm1210_vm3, %v2035_v25, %v1207_v41  ;;  %1911 = vmatpush.msra.mxu3 (%p792_p0), %v1285_v16  ;;  %1349 = vmatpush.msra.mxu1 (%p792_p0), %v1285_v16  ;;  %v1280_v25 = vld [vmem:[%s3010_s11 + $0x88] sm:$0xff] (%p792_p0)  ;;  %v1251_v27 = vld [vmem:[#allocation4 + $0x20] sm:$0xff] (%p792_p0)  ;;  %v1253_v35 = vld [vmem:[#allocation4 + $0x30] sm:$0xff] (%p792_p0) }
 0x2ef   : > { %v1216_v48 = vsel %vm1213_vm5, %v1215_v42, %v1211_v46  ;;  %v1239_v51 = vmul.f32 %v2039_v47, %v1197_v45  ;;  %v1247_v29 = vld [vmem:[#allocation4] sm:$0xff] (%p792_p0)  ;;  %v1252_v31 = vld [vmem:[#allocation4 + $0x28] sm:$0xff] (%p792_p0)  ;;  %v1254_v39 = vld [vmem:[#allocation4 + $0x38] sm:$0xff] (%p792_p0) }
 0x2f0   : > { %v1226_v49 = vmul.f32 %v2037_v37, %v1225_v44  ;;  %v1238_v50 = vmul.f32 %v2225_v5, %v1216_v48  ;;  %1912 = vmatpush.msra.mxu3 (%p792_p0), %v1284_v18  ;;  %1350 = vmatpush.msra.mxu1 (%p792_p0), %v1284_v18  ;;  %v1248_v33 = vld [vmem:[#allocation4 + $0x8] sm:$0xff] (%p792_p0)  ;;  %v1250_v41 = vld [vmem:[#allocation4 + $0x18] sm:$0xff] (%p792_p0)  ;;  %v2042_v43 = vld [vmem:[%s3011_s12] ss:$0 sm:$0xff] (%p792_p0)  ;;  %v1392_v44 = vlaneseq (%p792_p0) }
 0x2f1   :  { %v2786_v48 = vld [vmem:[%s3014_s15] sm:$0x1f] (%p792_p0) }
 0x2f2   : > { %v1240_v5 = vadd.f32 %v1239_v51, %v1238_v50   ;;  %v1227_v52 = vadd.f32 %v2037_v37, %v1226_v49  ;;  %1913 = vmatpush.msra.mxu3 (%p792_p0), %v1283_v19  ;;  %1351 = vmatpush.msra.mxu1 (%p792_p0), %v1283_v19  ;;  %v2791_v49 = vld [vmem:[%s3001_s2] sm:$0xff] (%p792_p0)  ;;  %v2793_v50 = vshrl.u32 (%p792_p0), %v1392_v44, 7  ;;  %v2795_v51 = vand.u32 (%p792_p0), 127, %v1392_v44 }
 0x2f4   : > { %2040 = vtanh.f32 %v1240_v5  ;;  %v1231_v58 = vsel %vm1230_vm8, %v2037_v37, %v1227_v52  ;;  %v1276_v5 = vld [vmem:[%s3010_s11 + $0x68] sm:$0xff] (%p792_p0)  ;;  %1914 = vmatpush.msra.mxu3 (%p792_p0), %v1282_v21  ;;  %1352 = vmatpush.msra.mxu1 (%p792_p0), %v1282_v21  ;;  %v1249_v37 = vld [vmem:[#allocation4 + $0x10] sm:$0xff] (%p792_p0) }
 0x2f5   : > { %v1236_v54 = vsel %vm1233_vm9, %v1235_v62, %v1231_v58  ;;  %1888 = vmatpush.msra.mxu2 (%p792_p0), %v1276_v5  ;;  %1301 = vmatpush.msra.mxu0 (%p792_p0), %v1276_v5 }
 0x2f6   :  { %1915 = vmatpush.msra.mxu3 (%p792_p0), %v1281_v23  ;;  %1353 = vmatpush.msra.mxu1 (%p792_p0), %v1281_v23 }
 0x2f7   :  { %1889 = vmatpush.msra.mxu2 (%p792_p0), %v1275_v57  ;;  %1302 = vmatpush.msra.mxu0 (%p792_p0), %v1275_v57 }
 0x2f8   :  { %1916 = vmatpush.msra.mxu3 (%p792_p0), %v1280_v25  ;;  %1354 = vmatpush.msra.mxu1 (%p792_p0), %v1280_v25 }
 0x2f9   :  { %794 = sbr.rel (!%p792_p0) target bundleno = 530 (0x212), region = 136  ;;  %1890 = vmatpush.msra.mxu2 (%p792_p0), %v1274_v3  ;;  %1303 = vmatpush.msra.mxu0 (%p792_p0), %v1274_v3 }
 0x2fa   : > { %v2041_v63 = vpop.eup %2040  ;;  %1917 = vmatpush.msra.mxu3 (%p792_p0), %v1279_v12  ;;  %1355 = vmatpush.msra.mxu1 (%p792_p0), %v1279_v12 }
 0x2fb   : > { %v1242_v60 = vmul.f32 %v2041_v63, %v1236_v54   ;;  %1891 = vmatpush.msra.mxu2 (%p792_p0), %v1273_v61  ;;  %1304 = vmatpush.msra.mxu0 (%p792_p0), %v1273_v61 }
 0x2fd   : > { %1246 = vst [vmem:[%s1245_s27] sm:$0xff] %v1242_v60  ;;  %1892 = vmatpush.msra.mxu2 (%p792_p0), %v1272_v8  ;;  %1305 = vmatpush.msra.mxu0 (%p792_p0), %v1272_v8  ;;  %v1267_v60 = vld [vmem:[%s3010_s11 + $0x20] sm:$0xff] (%p792_p0) }
 0x2ff   :  { %1893 = vmatpush.msra.mxu2 %v1271_v10  ;;  %1306 = vmatpush.msra.mxu0 %v1271_v10 }
 0x301   :  { %1894 = vmatpush.msra.mxu2 %v1270_v13  ;;  %1307 = vmatpush.msra.mxu0 %v1270_v13 }
 0x303   :  { %1895 = vmatpush.msra.mxu2 %v1269_v15  ;;  %1308 = vmatpush.msra.mxu0 %v1269_v15 }
 0x304   :  { %v1259_v28 = vld [vmem:[#allocation5 + $0x20] sm:$0xff]  ;;  %v1260_v32 = vld [vmem:[#allocation5 + $0x28] sm:$0xff]  ;;  %v1261_v36 = vld [vmem:[#allocation5 + $0x30] sm:$0xff] }
 0x305   :  { %1896 = vmatpush.msra.mxu2 %v1268_v17  ;;  %1309 = vmatpush.msra.mxu0 %v1268_v17  ;;  %v1255_v30 = vld [vmem:[#allocation5] sm:$0xff]  ;;  %v1256_v34 = vld [vmem:[#allocation5 + $0x8] sm:$0xff]  ;;  %v1257_v38 = vld [vmem:[#allocation5 + $0x10] sm:$0xff] }
 0x306   :  { %1368 = vmatmul.f32.vlgmr.msra.gmra.mxu3 %v1259_v28  ;;  %1356 = vmatmul.f32.vlgmr.msra.gmra.mxu1 %v1255_v30  ;;  %v1262_v40 = vld [vmem:[#allocation5 + $0x38] sm:$0xff] }
 0x307   :  { %1897 = vmatpush.msra.mxu2 %v1267_v60  ;;  %1310 = vmatpush.msra.mxu0 %v1267_v60  ;;  %v1258_v42 = vld [vmem:[#allocation5 + $0x18] sm:$0xff] }
 0x309   :  { %1898 = vmatpush.msra.mxu2 %v1266_v20  ;;  %1311 = vmatpush.msra.mxu0 %v1266_v20 }
 0x30b   :  { %1899 = vmatpush.msra.mxu2 %v1265_v22  ;;  %1312 = vmatpush.msra.mxu0 %v1265_v22 }
 0x30d   :  { %1900 = vmatpush.msra.mxu2 %v1264_v24  ;;  %1313 = vmatpush.msra.mxu0 %v1264_v24 }
 0x30e   :  { %1371 = vmatmul.f32.gmra.mxu3 %v1260_v32  ;;  %1359 = vmatmul.f32.gmra.mxu1 %v1256_v34 }
 0x30f   :  { %1901 = vmatpush.msra.mxu2 %v1263_v26  ;;  %1314 = vmatpush.msra.mxu0 %v1263_v26 }
 0x310   :  { %1327 = vmatmul.f32.vlgmr.msra.gmra.mxu2 %v1251_v27  ;;  %1315 = vmatmul.f32.vlgmr.msra.gmra.mxu0 %v1247_v29 }
 0x316   :  { %1374 = vmatmul.f32.gmra.mxu3 %v1261_v36  ;;  %1362 = vmatmul.f32.gmra.mxu1 %v1257_v38 }
 0x318   :  { %1330 = vmatmul.f32.gmra.mxu2 %v1252_v31  ;;  %1318 = vmatmul.f32.gmra.mxu0 %v1248_v33 }
 0x31e   :  { %1377 = vmatmul.f32.gmra.mxu3 %v1262_v40  ;;  %1365 = vmatmul.f32.gmra.mxu1 %v1258_v42 }
 0x320   :  { %1333 = vmatmul.f32.gmra.mxu2 %v1253_v35  ;;  %1321 = vmatmul.f32.gmra.mxu0 %v1249_v37 }
 0x328   :  { %1336 = vmatmul.f32.gmra.mxu2 %v1254_v39  ;;  %1324 = vmatmul.f32.gmra.mxu0 %v1250_v41 }
 0x383   :  { %v1357_v46 = vpop.f32.mrf.mxu1 }
 0x389   :  { %v1369_v56 = vpop.f32.mrf.mxu3 }
 0x38b   :  { %v1360_v54 = vpop.f32.mrf.mxu1 }
 0x38d   :  { %v1316_v45 = vpop.f32.mrf.mxu0 }
 0x38e   :  { %v1317_v47 = vadd.f32 %v2042_v43, %v1316_v45 }
 0x390   :  { %v1358_v52 = vadd.f32 %v1357_v46, %v1317_v47 }
 0x391   :  { %v1372_v6 = vpop.f32.mrf.mxu3 }
 0x392   :  { %1382 = vst.msk [vmem:[%s3015_s16] sm:$0xff] %vm1381_vm10, %v1358_v52 }
 0x393   :  { %v1328_v53 = vpop.f32.mrf.mxu2  ;;  %v1363_v61 = vpop.f32.mrf.mxu1 }
 0x394   :  { %v1329_v58 = vadd.f32 %v2042_v43, %v1328_v53 }
 0x395   :  { %v1319_v63 = vpop.f32.mrf.mxu0 }
 0x396   :  { %v1370_v62 = vadd.f32 %v1369_v56, %v1329_v58  ;;  %v1320_v55 = vadd.f32 %v2042_v43, %v1319_v63 }
 0x398   :  { %1386 = vst.msk [vmem:[%s3015_s16 + $0x20] sm:$0xff] %vm1381_vm10, %v1370_v62  ;;  %v1361_v1 = vadd.f32 %v1360_v54, %v1320_v55 }
 0x399   :  { %v1397_v2 = vld [vmem:[%s3015_s16] sm:$0xff]  ;;  %v1375_v10 = vpop.f32.mrf.mxu3 }
 0x39a   :  { %v1401_v57 = vadd.f32 %v2043_v0, %v1397_v2   ;;  %1383 = vst.msk [vmem:[%s3015_s16 + $0x8] sm:$0xff] %vm1381_vm10, %v1361_v1 }
 0x39b   :  { %v1331_v5 = vpop.f32.mrf.mxu2  ;;  %v1366_v15 = vpop.f32.mrf.mxu1 }
 0x39c   :  { %v1332_v59 = vadd.f32 %v2042_v43, %v1331_v5 }
 0x39d   :  { %v1322_v4 = vpop.f32.mrf.mxu0 }
 0x39e   :  { %v1373_v3 = vadd.f32 %v1372_v6, %v1332_v59  ;;  %v1323_v7 = vadd.f32 %v2042_v43, %v1322_v4 }
 0x3a0   :  { %1387 = vst.msk [vmem:[%s3015_s16 + $0x28] sm:$0xff] %vm1381_vm10, %v1373_v3  ;;  %v1364_v8 = vadd.f32 %v1363_v61, %v1323_v7 }
 0x3a1   :  { %v1378_v60 = vpop.f32.mrf.mxu3 }
 0x3a2   :  { %1384 = vst.msk [vmem:[%s3015_s16 + $0x10] sm:$0xff] %vm1381_vm10, %v1364_v8 }
 0x3a3   :  { %v1334_v9 = vpop.f32.mrf.mxu2 }
 0x3a4   :  { %v1335_v11 = vadd.f32 %v2042_v43, %v1334_v9 }
 0x3a5   :  { %v1325_v14 = vpop.f32.mrf.mxu0 }
 0x3a6   :  { %v1376_v13 = vadd.f32 %v1375_v10, %v1335_v11  ;;  %v1326_v16 = vadd.f32 %v2042_v43, %v1325_v14 }
 0x3a8   :  { %1388 = vst.msk [vmem:[%s3015_s16 + $0x30] sm:$0xff] %vm1381_vm10, %v1376_v13  ;;  %v1367_v17 = vadd.f32 %v1366_v15, %v1326_v16 }
 0x3aa   :  { %1385 = vst.msk [vmem:[%s3015_s16 + $0x18] sm:$0xff] %vm1381_vm10, %v1367_v17 }
 0x3ab   :  { %v1337_v18 = vpop.f32.mrf.mxu2 }
 0x3ac   :  { %v1338_v19 = vadd.f32 %v2042_v43, %v1337_v18 }
 0x3ae   :  { %v1379_v20 = vadd.f32 %v1378_v60, %v1338_v19 }
 0x3b0   :  { %1389 = vst.msk [vmem:[%s3015_s16 + $0x38] sm:$0xff] %vm1381_vm10, %v1379_v20 }
 0x3b1 LB: > { %2045 = vset.pattern.permute.xlu1 %v2793_v50  ;;  %2044 = vset.pattern.permute.xlu0 %v2793_v50  ;;  %v1426_v21 = vperm.slane %v2245_v57, 2  ;;  %v1412_v22 = vperm.slane %v2245_v57, 0  ;;  %v1440_v23 = vperm.slane %v2245_v57, 4  ;;  %v1433_v24 = vperm.slane %v2245_v57, 3  ;;  %s1875_s23 = sshll.u32 %s2249_s22, 3  ;;  %s1876_s25 = sadd.s32 4294967295, %s2249_s22  ;;  %s2249_s22 = sphi %s2837_s22, %s1407_s22   ;;  %v2245_v57 = vphi %v1401_v57, %v3031_v57  }
 0x3b2   : > { %2046 = vset.pattern.permute.xlu2 %v2793_v50  ;;  %v1419_v25 = vperm.slane %v2245_v57, 1  ;;  %v1447_v26 = vperm.slane %v2245_v57, 5  ;;  %v1679_v12 = vstv %s2249_s22  ;;  %v1461_v27 = vperm.slane %v2245_v57, 7  ;;  %s1410_s24 = scalar_lea.vmem %s3015_s16, %s1875_s23  ;;  %s1877_s3 = sshll.u32 %s1876_s25, 3 }
 0x3b3   : > { %v1454_v28 = vperm.slane %v2245_v57, 6  ;;  %vm1680_vm11 = vcmp.gt.s32.totalorder %v2791_v49, %v1679_v12  ;;  %v2270_v29 = vmov 0   ;;  %vm1508_vm12 = vcmask 36864   ;;  %s1677_s27 = scalar_lea.vmem [#allocation6], %s1877_s3  ;;  %s1407_s22 = sadd.s32 1, %s2249_s22  }
 0x3b4   : > { %v1681_v30 = vsel %vm1680_vm11, 1, %v2270_v29  ;;  %vm1663_vm3 = vcmask 1041409   ;;  %vm1665_vm4 = vcmask 1042434   ;;  %vm1667_vm8 = vcmask 1043459   ;;  %p1404_p1 = scmp.ge.s32.totalorder %s1407_s22, 8  }
 0x3b7   : > { %v2862_v31 = vld [vmem:[%s1410_s24] sm:$0xff] }
 0x3b8   : > { %v1480_v32 = vrot.slane %v2862_v31, 4  ;;  %v1481_v37 = vrot.slane %v2862_v31, 5  ;;  %v1478_v63 = vrot.slane %v2862_v31, 2  ;;  %v1484_v1 = vperm.slane %v2862_v31, 0 }
 0x3b9   : > { %1431 = vperm.xlu1 %2045, %v1426_v21   ;;  %1417 = vperm.xlu0 %2044, %v1412_v22   ;;  %v1479_v61 = vrot.slane %v2862_v31, 3  ;;  %v1477_v10 = vrot.slane %v2862_v31, 1 }
 0x3ba   : > { %1445 = vperm.xlu2 %2046, %v1440_v23   ;;  %v1488_v33 = vperm.slane %v1480_v32, 0  ;;  %v1489_v40 = vperm.slane %v1481_v37, 0  ;;  %v1486_v55 = vperm.slane %v1478_v63, 0 }
 0x3bb   : > { %v1487_v17 = vperm.slane %v1479_v61, 0  ;;  %v1485_v18 = vperm.slane %v1477_v10, 0 }
 0x3c1   : > { %1438 = vperm.xlu1 %2045, %v1433_v24   ;;  %1424 = vperm.xlu0 %2044, %v1419_v25  }
 0x3c2   : > { %1452 = vperm.xlu2 %2046, %v1447_v26  }
 0x3c9   : > { %1466 = vperm.xlu1 %2045, %v1461_v27   ;;  %1459 = vperm.xlu0 %2044, %v1454_v28   ;;  %v1483_v28 = vrot.slane %v2862_v31, 7 }
 0x3ca   : > { %2047 = vset.pattern.permute.xlu2 %v2270_v29 }
 0x3cb   : > { %1683 = vperm.xlu2 %2047, %v1681_v30  }
 0x3d1   : > { %2048 = vset.pattern.permute.xlu0 %v2270_v29 }
 0x414   : > { %v1446_v34 = vpop.permute.xlu2 %1445 }
 0x415   : > { %v1472_v35 = vadd.f32 %v1446_v34, %v2786_v48 }
 0x417   : > { %v1504_v36 = vadd.f32 %v1488_v33, %v1472_v35  ;;  %v1482_v33 = vrot.slane %v2862_v31, 6 }
 0x419   : > { %v1537_v38 = vsel %vm1508_vm12, %v1504_v36, -inf  ;;  %v1490_v31 = vperm.slane %v1482_v33, 0 }
 0x41a   : > { %v1538_v39 = vrot.slane %v1537_v38, 4 }
 0x41c   : > { %v1539_v41 = vmax.f32 %v1537_v38, %v1538_v39  ;;  %v1453_v42 = vpop.permute.xlu2 %1452 }
 0x41d   : > { %v1473_v43 = vadd.f32 %v1453_v42, %v2786_v48  ;;  %v1491_v42 = vperm.slane %v1483_v28, 0 }
 0x41e   : > { %v1540_v44 = vrot.slane %v1539_v41, 2 }
 0x41f   : > { %v1505_v45 = vadd.f32 %v1489_v40, %v1473_v43 }
 0x420   : > { %v1541_v46 = vmax.f32 %v1539_v41, %v1540_v44 }
 0x421   : > { %v1544_v47 = vsel %vm1508_vm12, %v1505_v45, -inf }
 0x422   : > { %v1542_v52 = vrot.slane %v1541_v46, 1  ;;  %v1545_v53 = vrot.slane %v1544_v47, 4 }
 0x424   : > { %v2870_v56 = vmax.f32 %v1541_v46, %v1542_v52  ;;  %v1546_v58 = vmax.f32 %v1544_v47, %v1545_v53 }
 0x426   : > { %vm1569_vm13 = vcmp.ge.f32.partialorder %v1504_v36, %v2870_v56  ;;  %v1547_v62 = vrot.slane %v1546_v58, 2 }
 0x427   : > { %v1577_v54 = vsel %vm1569_vm13, %v2793_v50, 5  ;;  %vm1669_vm13 = vcmask 1044484  }
 0x428   : > { %v1548_v0 = vmax.f32 %v1546_v58, %v1547_v62  ;;  %v1621_v2 = vsel %vm1508_vm12, %v1577_v54, 2147483647 }
 0x429   : > { %v1622_v7 = vrot.slane %v1621_v2, 4 }
 0x42a   : > { %v1549_v59 = vrot.slane %v1548_v0, 1 }
 0x42b   : > { %v1432_v5 = vpop.permute.xlu1 %1431  ;;  %v1418_v6 = vpop.permute.xlu0 %1417  ;;  %vm1623_vm14 = vcmp.lt.s32.totalorder %v1621_v2, %v1622_v7 }
 0x42c   : > { %v1470_v3 = vadd.f32 %v1432_v5, %v2786_v48  ;;  %v1468_v4 = vadd.f32 %v1418_v6, %v2786_v48  ;;  %v2881_v11 = vmax.f32 %v1548_v0, %v1549_v59  ;;  %v1624_v24 = vsel %vm1623_vm14, %v1621_v2, %v1622_v7 }
 0x42d   : > { %v1625_v34 = vrot.slane %v1624_v24, 2  ;;  %vm1671_vm14 = vcmask 1045509  }
 0x42e   : > { %v1502_v8 = vadd.f32 %v1486_v55, %v1470_v3  ;;  %v1500_v9 = vadd.f32 %v1484_v1, %v1468_v4  ;;  %vm1570_vm15 = vcmp.ge.f32.partialorder %v1505_v45, %v2881_v11 }
 0x42f   : > { %v1578_v29 = vsel %vm1570_vm15, %v2793_v50, 5  ;;  %vm2902_vm0 = vcmp.lt.s32.totalorder %v1624_v24, %v1625_v34 }
 0x430   : > { %v1523_v13 = vsel %vm1508_vm12, %v1502_v8, -inf  ;;  %v1509_v14 = vsel %vm1508_vm12, %v1500_v9, -inf  ;;  %v1631_v40 = vsel %vm1508_vm12, %v1578_v29, 2147483647 }
 0x431   : > { %v1524_v15 = vrot.slane %v1523_v13, 4  ;;  %v1510_v16 = vrot.slane %v1509_v14, 4  ;;  %v1632_v63 = vrot.slane %v1631_v40, 4 }
 0x433   : > { %v1525_v60 = vmax.f32 %v1523_v13, %v1524_v15  ;;  %v1511_v19 = vmax.f32 %v1509_v14, %v1510_v16  ;;  %v1439_v20 = vpop.permute.xlu1 %1438  ;;  %v1425_v21 = vpop.permute.xlu0 %1424  ;;  %vm2919_vm5 = vcmp.lt.s32.totalorder %v1631_v40, %v1632_v63 }
 0x434   : > { %v1471_v22 = vadd.f32 %v1439_v20, %v2786_v48  ;;  %v1469_v23 = vadd.f32 %v1425_v21, %v2786_v48  ;;  %v2927_v20 = vsel %vm2902_vm0, %v1624_v24, %v1625_v34 }
 0x435   : > { %v1526_v25 = vrot.slane %v1525_v60, 2  ;;  %v1512_v26 = vrot.slane %v1511_v19, 2 }
 0x436   : > { %v2888_v12 = vadd.f32 %v1487_v17, %v1471_v22  ;;  %v2890_v27 = vadd.f32 %v1485_v18, %v1469_v23 }
 0x437   : > { %v1527_v30 = vmax.f32 %v1525_v60, %v1526_v25  ;;  %v1513_v32 = vmax.f32 %v1511_v19, %v1512_v26  ;;  %v1634_v25 = vsel %vm2919_vm5, %v1631_v40, %v1632_v63 }
 0x438   : > { %v1530_v35 = vsel %vm1508_vm12, %v2888_v12, -inf  ;;  %v1516_v36 = vsel %vm1508_vm12, %v2890_v27, -inf  ;;  %v1635_v33 = vrot.slane %v1634_v25, 2 }
 0x439   : > { %v1528_v37 = vrot.slane %v1527_v30, 1  ;;  %v1514_v38 = vrot.slane %v1513_v32, 1  ;;  %v1531_v39 = vrot.slane %v1530_v35, 4  ;;  %v1517_v41 = vrot.slane %v1516_v36, 4 }
 0x43b   : > { %v2900_v43 = vmax.f32 %v1527_v30, %v1528_v37  ;;  %v1515_v44 = vmax.f32 %v1513_v32, %v1514_v38  ;;  %v1532_v45 = vmax.f32 %v1530_v35, %v1531_v39  ;;  %v1467_v46 = vpop.permute.xlu1 %1466  ;;  %v1460_v47 = vpop.permute.xlu0 %1459  ;;  %v1518_v53 = vmax.f32 %v1516_v36, %v1517_v41 }
 0x43c   : > { %v1475_v58 = vadd.f32 %v1467_v46, %v2786_v48  ;;  %v1474_v62 = vadd.f32 %v1460_v47, %v2786_v48  ;;  %v1628_v30 = vrot.slane %v2927_v20, 1  ;;  %v1684_v47 = vpop.permute.xlu2 %1683 }
 0x43d   : > { %vm1567_vm1 = vcmp.ge.f32.partialorder %v1502_v8, %v2900_v43  ;;  %vm1565_vm2 = vcmp.ge.f32.partialorder %v1500_v9, %v1515_v44  ;;  %v1533_v54 = vrot.slane %v1532_v45, 2  ;;  %v1519_v1 = vrot.slane %v1518_v53, 2 }
 0x43e   : > { %v1575_v0 = vsel %vm1567_vm1, %v2793_v50, 5  ;;  %v1573_v55 = vsel %vm1565_vm2, %v2793_v50, 5  ;;  %v2911_v2 = vadd.f32 %v1491_v42, %v1475_v58  ;;  %v2915_v3 = vadd.f32 %v1490_v31, %v1474_v62 }
 0x43f   : > { %v1601_v5 = vsel %vm1508_vm12, %v1575_v0, 2147483647  ;;  %v1581_v6 = vsel %vm1508_vm12, %v1573_v55, 2147483647  ;;  %v1534_v59 = vmax.f32 %v1532_v45, %v1533_v54  ;;  %v1520_v7 = vmax.f32 %v1518_v53, %v1519_v1 }
 0x440   : > { %v1602_v4 = vrot.slane %v1601_v5, 4  ;;  %v1582_v61 = vrot.slane %v1581_v6, 4  ;;  %v1558_v8 = vsel %vm1508_vm12, %v2911_v2, -inf  ;;  %v1551_v14 = vsel %vm1508_vm12, %v2915_v3, -inf }
 0x441   : > { %v1535_v10 = vrot.slane %v1534_v59, 1  ;;  %v1559_v13 = vrot.slane %v1558_v8, 4  ;;  %v1521_v15 = vrot.slane %v1520_v7, 1  ;;  %v1552_v16 = vrot.slane %v1551_v14, 4 }
 0x442   : > { %vm1603_vm6 = vcmp.lt.s32.totalorder %v1601_v5, %v1602_v4  ;;  %vm1583_vm7 = vcmp.lt.s32.totalorder %v1581_v6, %v1582_v61  ;;  %vm1673_vm2 = vcmask 1046534  }
 0x443   : > { %v1604_v17 = vsel %vm1603_vm6, %v1601_v5, %v1602_v4  ;;  %v1584_v18 = vsel %vm1583_vm7, %v1581_v6, %v1582_v61  ;;  %v1536_v60 = vmax.f32 %v1534_v59, %v1535_v10  ;;  %v1560_v19 = vmax.f32 %v1558_v8, %v1559_v13 }
 0x444   : > { %v1605_v21 = vrot.slane %v1604_v17, 2  ;;  %v1585_v22 = vrot.slane %v1584_v18, 2  ;;  %v1522_v23 = vmax.f32 %v1520_v7, %v1521_v15  ;;  %v1553_v28 = vmax.f32 %v1551_v14, %v1552_v16 }
 0x445   : > { %vm1568_vm9 = vcmp.ge.f32.partialorder %v2888_v12, %v1536_v60  ;;  %v1561_v26 = vrot.slane %v1560_v19, 2  ;;  %vm1675_vm6 = vcmask 1047559   ;;  %vm1636_vm7 = vcmp.lt.s32.totalorder %v1634_v25, %v1635_v33 }
 0x446   : > { %v1576_v29 = vsel %vm1568_vm9, %v2793_v50, 5  ;;  %vm1566_vm11 = vcmp.ge.f32.partialorder %v2890_v27, %v1522_v23  ;;  %vm1586_vm15 = vcmp.lt.s32.totalorder %v1584_v18, %v1585_v22  ;;  %vm1606_vm0 = vcmp.lt.s32.totalorder %v1604_v17, %v1605_v21 }
 0x447   : > { %v1611_v24 = vsel %vm1508_vm12, %v1576_v29, 2147483647  ;;  %v1574_v32 = vsel %vm1566_vm11, %v2793_v50, 5  ;;  %v1694_v36 = vsel %vm1663_vm3, %v1522_v23, %v1515_v44  ;;  %v1562_v37 = vmax.f32 %v1560_v19, %v1561_v26 }
 0x448   : > { %v1612_v34 = vrot.slane %v1611_v24, 4  ;;  %v1591_v12 = vsel %vm1508_vm12, %v1574_v32, 2147483647  ;;  %v1554_v38 = vrot.slane %v1553_v28, 2  ;;  %v1587_v27 = vsel %vm1586_vm15, %v1584_v18, %v1585_v22 }
 0x449   : > { %v1592_v35 = vrot.slane %v1591_v12, 4  ;;  %v1695_v39 = vsel %vm1665_vm4, %v2900_v43, %v1694_v36  ;;  %v1607_v40 = vsel %vm1606_vm0, %v1604_v17, %v1605_v21  ;;  %v1563_v46 = vrot.slane %v1562_v37, 1 }
 0x44a   : > { %vm1613_vm1 = vcmp.lt.s32.totalorder %v1611_v24, %v1612_v34  ;;  %v1555_v31 = vmax.f32 %v1553_v28, %v1554_v38  ;;  %v1588_v52 = vrot.slane %v1587_v27, 1  ;;  %v1696_v53 = vsel %vm1667_vm8, %v1536_v60, %v1695_v39 }
 0x44b   : > { %v1614_v41 = vsel %vm1613_vm1, %v1611_v24, %v1612_v34  ;;  %vm1593_vm5 = vcmp.lt.s32.totalorder %v1591_v12, %v1592_v35  ;;  %v1564_v58 = vmax.f32 %v1562_v37, %v1563_v46  ;;  %v1697_v43 = vsel %vm1669_vm13, %v2870_v56, %v1696_v53 }
 0x44c   : > { %v1615_v42 = vrot.slane %v1614_v41, 2  ;;  %v1594_v45 = vsel %vm1593_vm5, %v1591_v12, %v1592_v35  ;;  %v1556_v62 = vrot.slane %v1555_v31, 1  ;;  %v1608_v63 = vrot.slane %v1607_v40, 1 }
 0x44d   : > { %v1595_v44 = vrot.slane %v1594_v45, 2  ;;  %vm1685_vm15 = vcmp.eq.s32.totalorder %v1684_v47, 1  ;;  %v1637_v0 = vsel %vm1636_vm7, %v1634_v25, %v1635_v33  ;;  %vm1572_vm0 = vcmp.ge.f32.partialorder %v2911_v2, %v1564_v58 }
 0x44e   : > { %vm1616_vm9 = vcmp.lt.s32.totalorder %v1614_v41, %v1615_v42  ;;  %v1557_v1 = vmax.f32 %v1555_v31, %v1556_v62  ;;  %vm1589_vm1 = vcmp.lt.s32.totalorder %v1587_v27, %v1588_v52  ;;  %v1580_v6 = vsel %vm1572_vm0, %v2793_v50, 5 }
 0x44f   : > { %v1617_v54 = vsel %vm1616_vm9, %v1614_v41, %v1615_v42  ;;  %vm1596_vm11 = vcmp.lt.s32.totalorder %v1594_v45, %v1595_v44  ;;  %v1698_v59 = vsel %vm1671_vm14, %v2881_v11, %v1697_v43  ;;  %v1651_v61 = vsel %vm1508_vm12, %v1580_v6, 2147483647 }
 0x450   : > { %v1597_v55 = vsel %vm1596_vm11, %v1594_v45, %v1595_v44  ;;  %v1618_v4 = vrot.slane %v1617_v54, 1  ;;  %vm1571_vm5 = vcmp.ge.f32.partialorder %v2915_v3, %v1557_v1  ;;  %v1699_v56 = vsel %vm1673_vm2, %v1557_v1, %v1698_v59 }
 0x451   : > { %v1598_v5 = vrot.slane %v1597_v55, 1  ;;  %vm1609_vm9 = vcmp.lt.s32.totalorder %v1607_v40, %v1608_v63  ;;  %v1652_v7 = vrot.slane %v1651_v61, 4  ;;  %v1579_v2 = vsel %vm1571_vm5, %v2793_v50, 5 }
 0x452   : > { %v1590_v8 = vsel %vm1589_vm1, %v1587_v27, %v1588_v52  ;;  %v1641_v10 = vsel %vm1508_vm12, %v1579_v2, 2147483647  ;;  %v1700_v13 = vsel %vm1675_vm6, %v1564_v58, %v1699_v56  ;;  %v1610_v15 = vsel %vm1609_vm9, %v1607_v40, %v1608_v63 }
 0x453   : > { %vm1599_vm7 = vcmp.lt.s32.totalorder %v1597_v55, %v1598_v5  ;;  %vm1653_vm11 = vcmp.lt.s32.totalorder %v1651_v61, %v1652_v7  ;;  %v1642_v14 = vrot.slane %v1641_v10, 4  ;;  %v1702_v3 = vsel %vm1685_vm15, %v1700_v13, %v2245_v57  }
 0x454   : > { %v1600_v9 = vsel %vm1599_vm7, %v1597_v55, %v1598_v5  ;;  %vm1619_vm0 = vcmp.lt.s32.totalorder %v1617_v54, %v1618_v4  ;;  %v1654_v16 = vsel %vm1653_vm11, %v1651_v61, %v1652_v7  ;;  %v1638_v60 = vrot.slane %v1637_v0, 1 }
 0x455   : > { %v1664_v11 = vsel %vm1663_vm3, %v1600_v9, %v1590_v8  ;;  %v1655_v18 = vrot.slane %v1654_v16, 2  ;;  %vm1643_vm1 = vcmp.lt.s32.totalorder %v1641_v10, %v1642_v14  ;;  %vm1629_vm12 = vcmp.lt.s32.totalorder %v2927_v20, %v1628_v30 }
 0x456   : > { %v1666_v17 = vsel %vm1665_vm4, %v1610_v15, %v1664_v11  ;;  %v1644_v19 = vsel %vm1643_vm1, %v1641_v10, %v1642_v14  ;;  %v1620_v21 = vsel %vm1619_vm0, %v1617_v54, %v1618_v4  ;;  %v1630_v26 = vsel %vm1629_vm12, %v2927_v20, %v1628_v30  ;;  %v2051_v20 = vld [vmem:[%s3013_s14] ss:$0 sm:$0xff] (%p1404_p1)  ;;  %s2984_s14 = smov (%p1404_p1), 0  }
 0x457   : > { %vm1656_vm3 = vcmp.lt.s32.totalorder %v1654_v16, %v1655_v18  ;;  %v1645_v22 = vrot.slane %v1644_v19, 2  ;;  %v1668_v57 = vsel %vm1667_vm8, %v1620_v21, %v1666_v17  ;;  %vm1639_vm4 = vcmp.lt.s32.totalorder %v1637_v0, %v1638_v60 }
 0x458   : > { %v1657_v23 = vsel %vm1656_vm3, %v1654_v16, %v1655_v18  ;;  %v1670_v24 = vsel %vm1669_vm13, %v1630_v26, %v1668_v57  ;;  %v1640_v32 = vsel %vm1639_vm4, %v1637_v0, %v1638_v60  ;;  %v3031_v57 = vmov %v1702_v3 }
 0x459   : > { %v1658_v25 = vrot.slane %v1657_v23, 1  ;;  %vm1646_vm15 = vcmp.lt.s32.totalorder %v1644_v19, %v1645_v22  ;;  %v1672_v12 = vsel %vm1671_vm14, %v1640_v32, %v1670_v24  ;;  %v1707_v30 = vadd.f32 (%p1404_p1), %v2051_v20, %v1702_v3 }
 0x45a   : > { %v1647_v28 = vsel %vm1646_vm15, %v1644_v19, %v1645_v22  ;;  %v2271_v42 = vmov (%p1404_p1), 0   ;;  %v1878_v31 = vadd.s32 (%p1404_p1), 4294967295, %v2791_v49 }
 0x45b   : > { %vm1659_vm5 = vcmp.lt.s32.totalorder %v1657_v23, %v1658_v25  ;;  %v1648_v29 = vrot.slane %v1647_v28, 1  ;;  %v1708_v37 = vsel (%p1404_p1), %vm1381_vm10, %v1707_v30, -inf  ;;  %2049 = vset.pattern.permute.xlu1 (%p1404_p1), %v2271_v42  ;;  %2050 = vset.pattern.permute.xlu0 (%p1404_p1), %v2271_v42 }
 0x45c   : > { %v1660_v33 = vsel %vm1659_vm5, %v1657_v23, %v1658_v25  ;;  %1709 = vmax.xlane.f32.xlu0 (%p1404_p1), %v1708_v37 }
 0x45d   : > { %vm1649_vm9 = vcmp.lt.s32.totalorder %v1647_v28, %v1648_v29  ;;  %1406 = sbr.rel (!%p1404_p1) target bundleno = 945 (0x3b1), region = 147 }
 0x45e   : > { %v1650_v34 = vsel %vm1649_vm9, %v1647_v28, %v1648_v29 }
 0x45f   : > { %v1674_v35 = vsel %vm1673_vm2, %v1650_v34, %v1672_v12 }
 0x460   : > { %v1676_v36 = vsel %vm1675_vm6, %v1660_v33, %v1674_v35 }
 0x461   : > { %1678 = vst.msk [vmem:[%s1677_s27] sm:$0xff] %vm1381_vm10, %v1676_v36 }
 0x4cf   :  { %v1710_v38 = vpop.xlane.xlu0 %1709 }
 0x4d0   :  { %vm1711_vm8 = vcmp.ge.f32.partialorder %v1707_v30, %v1710_v38 }
 0x4d1   :  { %v1712_v27 = vsel %vm1711_vm8, %v2795_v51, 5 }
 0x4d2   :  { %v1713_v39 = vsel %vm1381_vm10, %v1712_v27, 2147483647 }
 0x4d3   :  { %v1715_v40 = vshra.s32 %v1713_v39, 16  ;;  %v1714_v48 = vand.u32 65535, %v1713_v39 }
 0x4d5   :  { %v1717_v41 = vcvt.s32.f32 %v1715_v40  ;;  %v1716_v45 = vcvt.s32.f32 %v1714_v48 }
 0x4d7   :  { %1718 = vmin.xlane.f32.xlu0 %v1717_v41 }
 0x54a   :  { %v1719_v50 = vpop.xlane.xlu0 %1718 }
 0x54b   :  { %vm1720_vm13 = vcmp.eq.f32.partialorder %v1717_v41, %v1719_v50  ;;  %v1725_v52 = vcvt.f32.s32 %v1719_v50 }
 0x54c   :  { %v1721_v46 = vsel %vm1720_vm13, %v1716_v45, inf }
 0x54d   :  { %1722 = vmin.xlane.f32.xlu1 %v1721_v46  ;;  %v1726_v53 = vshll.u32 %v1725_v52, 16 }
 0x566   :  { %1730 = vperm.xlu1 %2049, %v1878_v31  }
 0x5c0   :  { %v1723_v47 = vpop.xlane.xlu1 %1722 }
 0x5c1   :  { %v1724_v44 = vcvt.f32.s32 %v1723_v47 }
 0x5c3   :  { %v1727_v58 = vadd.s32 %v1726_v53, %v1724_v44  }
 0x5c5   :  { %v2255_v54 = vmov %v1727_v58  }
 0x5d8   :  { %v1731_v62 = vpop.permute.xlu1 %1730 }
 0x5d9   :  { %vm1732_vm14 = vcmp.eq.s32.totalorder %v2795_v51, %v1731_v62 }
 0x5da   :  { %v1733_v43 = vsel %vm1732_vm14, %v1727_v58, 0  }
 0x5db   :  { %v2251_v63 = vmov %v1733_v43  }
 0x5dc LB: > { %v2272_v49 = vmov 0   ;;  %s1742_s16 = ssub.s32 6, %s2261_s14  ;;  %s1739_s14 = sadd.s32 1, %s2261_s14   ;;  %s2261_s14 = sphi %s2984_s14, %s1739_s14   ;;  %v2257_v54 = vphi %v2255_v54, %v1766_v54   ;;  %v2253_v63 = vphi %v2251_v63, %v2252_v63  }
 0x5dd   : > { %2052 = vset.pattern.permute.xlu0 %v2272_v49  ;;  %2053 = vset.pattern.permute.xlu1 %v2272_v49  ;;  %s1879_s15 = sshll.u32 %s1742_s16, 3  ;;  %v1764_v56 = vstv %s1742_s16  ;;  %p1736_p2 = scmp.ge.s32.totalorder %s1739_s14, 7  }
 0x5de   : > { %1747 = vperm.xlu0 %2052, %v2257_v54   ;;  %2054 = vset.pattern.permute.xlu2 %v2272_v49  ;;  %s1744_s2 = scalar_lea.vmem [#allocation6], %s1879_s15  ;;  %vm1765_vm6 = vcmp.lt.s32.totalorder %v1764_v56, %v1878_v31  ;;  %vm1767_vm7 = vcmp.eq.s32.totalorder %v2795_v51, %v1764_v56  ;;  %vm1780_vm1 = vcmask (%p1736_p2), 64512   ;;  %s1791_s8 = sshll.u32 (%p1736_p2), %s3016_s17, 4  ;;  %s1792_s8 = int_to_ptr.hbm [resolvable:$true] %s1791_s8 }
 0x5df   : > { %v1745_v0 = vld [vmem:[%s1744_s2] sm:$0xff]  ;;  %v1770_v7 = vsel %vm1765_vm6, 1, %v2272_v49  ;;  %s2273_s28 = smov (%p1736_p2), [#allocation15]  }
 0x5e0   :  { %s1789_s9 = sshll.u32 (%p1736_p2), %s2273_s28, 4  ;;  %s1790_s9 = int_to_ptr.vmem [resolvable:$true] %s1789_s9 }
 0x650   : > { %v1748_v55 = vpop.permute.xlu0 %1747 }
 0x651   : > { %vm1749_vm2 = vcmp.eq.s32.totalorder %v2795_v51, %v1748_v55 }
 0x652   : > { %v1750_v1 = vsel %vm1749_vm2, %v1745_v0, 0 }
 0x653   : > { %v1751_v5 = vsel %vm1381_vm10, %v1750_v1, 0 }
 0x654   : > { %v1753_v6 = vshrl.u32 %v1751_v5, 16  ;;  %v1752_v59 = vand.u32 65535, %v1751_v5 }
 0x656   : > { %v1755_v4 = vcvt.s32.f32 %v1753_v6  ;;  %v1754_v61 = vcvt.s32.f32 %v1752_v59 }
 0x658   : > { %1758 = vadd.xlane.f32.xlu0 %v1755_v4  ;;  %1756 = vadd.xlane.f32.xlu1 %v1754_v61 }
 0x671   : > { %1772 = vperm.xlu1 %2053, %v1770_v7  }
 0x6cb   : > { %v1759_v2 = vpop.xlane.xlu0 %1758  ;;  %v1757_v8 = vpop.xlane.xlu1 %1756 }
 0x6cc   : > { %v1761_v9 = vcvt.f32.s32 %v1759_v2  ;;  %v1760_v13 = vcvt.f32.s32 %v1757_v8 }
 0x6ce   : > { %v1762_v10 = vshll.u32 %v1761_v9, 16 }
 0x6d0   : > { %v1763_v11 = vadd.s32 %v1762_v10, %v1760_v13 }
 0x6d2   : > { %v1766_v54 = vsel %vm1765_vm6, %v1763_v11, %v2257_v54  }
 0x6d3   : > { %1777 = vperm.xlu2 %2054, %v1766_v54  }
 0x6e3   : > { %v1773_v14 = vpop.permute.xlu1 %1772 }
 0x6e4   : > { %vm1774_vm11 = vcmp.eq.s32.totalorder %v1773_v14, 1 }
 0x6e5   : > { %vm1775_vm0 = vmand %vm1767_vm7, %vm1774_vm11 }
 0x72b   :  { %1738 = sbr.rel (!%p1736_p2) target bundleno = 1500 (0x5dc), region = 158 }
 0x72d   : > { %v1778_v3 = vpop.permute.xlu2 %1777 }
 0x72e   : > { %v1779_v15 = vsel %vm1775_vm0, %v1778_v3, %v2253_v63  }
 0x72f   : > { %v2252_v63 = vmov %v1779_v15   ;;  %1781 = vst.msk [vmem:[#allocation15] sm:$0xff] (%p1736_p2), %vm1780_vm1, %v1779_v15 }
 0x730   :  { %1794 = dma.vmem_to_hbm [thread:$0]  %s1790_s9, 128, %s1792_s8, [#allocation9]  }
 0x731   :  { %2221 = dma.done.wait [#allocation9], 128  }
 0x732   :  { %2222 = vsyncadd [#allocation9], 4294967168 }
 0x733   :  { %1801 = vsyncpa [#allocation8], 1 }
 0x734   :  { %1802 = vsyncpa [#allocation11], 1 }
 0x735   :  { %1803 = vsyncpa [#allocation14], 1 }
 0x736   :  { %1804 = vsyncpa [#allocation9], 1 }

</bundles_post_ra>
